<compile_context>
chip_gen: v5e
topology: v5e:2x2
jax: 0.10.0
libtpu: 0.0.40
codegen_flags: <defaults>
</compile_context>

<pallas_src>
import functools

import numpy as np
import jax
import jax.numpy as jnp
from jax.experimental import pallas as pl
from jax.experimental.pallas import tpu as pltpu

BN_EPS = 1e-5
RESNET152_LAYERS = (3, 8, 36, 3)   # bottleneck blocks per stage (resnet152)
STAGE_WIDTHS = (64, 128, 256, 512)
EXPANSION = 4


def _round_up(x, m):
    return ((x + m - 1) // m) * m


# ----------------------------------------------------------------------------
# Pallas kernels
# ----------------------------------------------------------------------------
def _mm_bn_kernel(x_ref, w_ref, shift_ref, o_ref, acc_ref, *, relu):
    # bf16 MXU matmul, f32 accumulator; BN shift (+ReLU) epilogue on last k step.
    @pl.when(pl.program_id(2) == 0)
    def _():
        acc_ref[...] = jnp.zeros_like(acc_ref)

    acc_ref[...] += jnp.dot(x_ref[...], w_ref[...],
                            preferred_element_type=jnp.float32)

    @pl.when(pl.program_id(2) == pl.num_programs(2) - 1)
    def _():
        y = acc_ref[...] + shift_ref[...]
        if relu:
            y = jnp.maximum(y, 0.0)
        o_ref[...] = y.astype(o_ref.dtype)


def _mm_bn_res_kernel(x_ref, w_ref, shift_ref, res_ref, o_ref, acc_ref, *, relu):
    # Same, but fuses the residual add (upcast to f32) before the ReLU.
    @pl.when(pl.program_id(2) == 0)
    def _():
        acc_ref[...] = jnp.zeros_like(acc_ref)

    acc_ref[...] += jnp.dot(x_ref[...], w_ref[...],
                            preferred_element_type=jnp.float32)

    @pl.when(pl.program_id(2) == pl.num_programs(2) - 1)
    def _():
        y = acc_ref[...] + shift_ref[...] + res_ref[...].astype(jnp.float32)
        if relu:
            y = jnp.maximum(y, 0.0)
        o_ref[...] = y.astype(o_ref.dtype)


def _maxpool_kernel(p_ref, o_ref):
    # p_ref: (kk, tr, L) stacked window taps -> max-reduce tap axis
    o_ref[...] = jnp.max(p_ref[...], axis=0)


# ----------------------------------------------------------------------------
# Kernel builders (cached per static config)
# ----------------------------------------------------------------------------
@functools.lru_cache(maxsize=None)
def _choose_tiles(M, K, C):
    # --- M tile: minimise zero-row padding, prefer the largest tile on ties.
    best = None
    for tm in (512, 384, 256, 128, 64, 32, 16, 8):
        Mp = _round_up(M, tm)
        waste = Mp - M
        if best is None or waste < best[0] or (waste == best[0] and tm > best[1]):
            best = (waste, tm, Mp)
    _, tm, Mp = best

    # --- Cout tile: as lane-dense as the channel count allows (up to 512).
    if C % 512 == 0:
        tn = 512
    elif C % 256 == 0:
        tn = 256
    elif C % 128 == 0:
        tn = 128
    else:
        tn = C                      # e.g. C=64 -> full channel dim

    # --- K tile: lane-pad K, allow deeper tk for the tiny-M late-stage layers.
    Kp = _round_up(K, 128)
    max_tk = 2048 if Mp <= 256 else 1024
    if Kp <= max_tk:
        tk = Kp
    else:
        nk = Kp // 128
        d = max(dd for dd in range(1, max_tk // 128 + 1) if nk % dd == 0)
        tk = 128 * d                # multiple of 128 that divides Kp

    # --- Megacore: make sure the two "parallel" grid axes expose >= 2 cells
    #     so both v7x TensorCores get work (also restores DMA/compute overlap
    #     for layers that would otherwise be a single pipeline step).
    while (Mp // tm) * (C // tn) < 2:
        if tm >= 16:
            tm //= 2
        elif tn >= 256:
            tn //= 2
        else:
            break
    return tm, tn, tk, Mp, Kp


def _weight_spec(tk, tn, extra_buffering):
    index_map = lambda i, j, k: (k, j)
    if extra_buffering:
        try:
            # Triple-buffer the weight stream for small-M, multi-k layers where
            # there is little compute per k step to hide the weight DMA behind.
            return pl.BlockSpec((tk, tn), index_map, pipeline_mode=pl.Buffered(3))
        except Exception:  # pragma: no cover - older jax without pipeline_mode
            pass
    return pl.BlockSpec((tk, tn), index_map)


@functools.lru_cache(maxsize=None)
def _get_mm_bn(Mp, Kp, C, tm, tn, tk, relu, fuse_residual):
    gi, gj, gk = Mp // tm, C // tn, Kp // tk
    grid = (gi, gj, gk)
    kernel = functools.partial(
        _mm_bn_res_kernel if fuse_residual else _mm_bn_kernel, relu=relu)
    buffer_w = (gi <= 2) and (gk >= 2)
    in_specs = [
        pl.BlockSpec((tm, tk), lambda i, j, k: (i, k)),
        _weight_spec(tk, tn, buffer_w),
        pl.BlockSpec((1, tn), lambda i, j, k: (0, j)),
    ]
    if fuse_residual:
        in_specs.append(pl.BlockSpec((tm, tn), lambda i, j, k: (i, j)))
    flops = 2 * Mp * Kp * C
    bytes_accessed = (Mp * Kp * 2 * gj                      # x re-streamed per j
                      + Kp * C * 2 * gi                     # w re-streamed per i
                      + Mp * C * 2 * (2 if fuse_residual else 1)  # out (+res) bf16
                      + C * 4)                              # shift
    return pl.pallas_call(
        kernel,
        out_shape=jax.ShapeDtypeStruct((Mp, C), jnp.bfloat16),
        grid=grid,
        in_specs=in_specs,
        out_specs=pl.BlockSpec((tm, tn), lambda i, j, k: (i, j)),
        scratch_shapes=[pltpu.VMEM((tm, tn), jnp.float32)],
        compiler_params=pltpu.CompilerParams(
            dimension_semantics=("parallel", "parallel", "arbitrary")),
        cost_estimate=pl.CostEstimate(
            flops=flops, transcendentals=0, bytes_accessed=bytes_accessed),
    )


@functools.lru_cache(maxsize=None)
def _pick_row_tile(R):
    for t in (1024, 512, 256, 128, 64, 32, 16, 8):
        if R % t == 0:
            return t
    return R


@functools.lru_cache(maxsize=None)
def _get_maxpool(KK, R, L, dtype_name):
    dtype = jnp.dtype(dtype_name)
    tr = _pick_row_tile(R)
    return pl.pallas_call(
        _maxpool_kernel,
        out_shape=jax.ShapeDtypeStruct((R, L), dtype),
        grid=(R // tr,),
        in_specs=[pl.BlockSpec((KK, tr, L), lambda i: (0, i, 0))],
        out_specs=pl.BlockSpec((tr, L), lambda i: (i, 0)),
        compiler_params=pltpu.CompilerParams(
            dimension_semantics=("parallel",)),
    )


# ----------------------------------------------------------------------------
# JAX glue: patch extraction and op wrappers (jitted per static shape)
# ----------------------------------------------------------------------------
def _im2col(x, kh, kw, stride, pad, pad_value=0.0):
    # x: (N, H, W, C) -> (N, Ho, Wo, kh*kw, C)   (keeps x's dtype, i.e. bf16)
    N, H, W, C = x.shape
    Ho = (H + 2 * pad - kh) // stride + 1
    Wo = (W + 2 * pad - kw) // stride + 1
    xp = jnp.pad(x, ((0, 0), (pad, pad), (pad, pad), (0, 0)),
                 constant_values=pad_value)
    cols = []
    for i in range(kh):
        for j in range(kw):
            cols.append(xp[:, i:i + stride * (Ho - 1) + 1:stride,
                           j:j + stride * (Wo - 1) + 1:stride, :])
    patches = jnp.stack(cols, axis=3)
    return patches, Ho, Wo


@functools.partial(jax.jit, static_argnames=("stride", "pad", "relu"))
def conv_bn(x, w, shift, residual=None, *, stride, pad, relu):
    # x: (N, H, W, Cin), w: (kh, kw, Cin, Cout) bf16 with BN scale folded in,
    # residual: matches the output shape (bf16, added in f32 in the epilogue).
    x = x.astype(jnp.bfloat16)   # cast BEFORE patch extraction (halves im2col HBM)
    N, H, W, Cin = x.shape
    kh, kw, _, Cout = w.shape
    if kh == 1 and kw == 1 and pad == 0:
        # 1x1 conv: no im2col, just a (strided) channel matmul
        xs = x[:, ::stride, ::stride, :]
        Ho, Wo = xs.shape[1], xs.shape[2]
        K = Cin
        xmat = xs.reshape(N * Ho * Wo, K)
    else:
        # TODO(synk): tap-fused 3x3 (kh*kw as an extra 'arbitrary' grid axis over
        #             shifted windows of the padded NHWC activation) would remove
        #             this bf16 im2col materialization entirely.
        patches, Ho, Wo = _im2col(x, kh, kw, stride, pad)
        K = kh * kw * Cin
        xmat = patches.reshape(N * Ho * Wo, K)
    M = N * Ho * Wo
    tm, tn, tk, Mp, Kp = _choose_tiles(M, K, Cout)

    wmat = w.reshape(K, Cout)
    if Mp != M or Kp != K:
        xmat = jnp.pad(xmat, ((0, Mp - M), (0, Kp - K)))
    if Kp != K:
        wmat = jnp.pad(wmat, ((0, Kp - K), (0, 0)))

    shift2 = shift.reshape(1, Cout)
    fn = _get_mm_bn(Mp, Kp, Cout, tm, tn, tk, bool(relu), residual is not None)
    if residual is not None:
        resmat = residual.astype(jnp.bfloat16).reshape(M, Cout)
        if Mp != M:
            resmat = jnp.pad(resmat, ((0, Mp - M), (0, 0)))
        out = fn(xmat, wmat, shift2, resmat)
    else:
        out = fn(xmat, wmat, shift2)
    if Mp != M:
        out = out[:M]
    return out.reshape(N, Ho, Wo, Cout)


@jax.jit
def max_pool_3x3_s2(x):
    # x is bf16 (conv1 output); max is exact in bf16 so pool entirely in bf16.
    N, H, W, C = x.shape
    patches, Ho, Wo = _im2col(x, 3, 3, 2, 1, pad_value=float("-inf"))
    M = N * Ho * Wo
    p = patches.transpose(3, 0, 1, 2, 4).reshape(9, M, C)
    # lane-dense view: fold C=64 into 128-wide rows when the layout allows it
    if (M * C) % 128 == 0 and ((M * C) // 128) % 8 == 0:
        R, L = (M * C) // 128, 128
    else:
        R, L = M, C
    out = _get_maxpool(9, R, L, jnp.dtype(x.dtype).name)(p.reshape(9, R, L))
    return out.reshape(N, Ho, Wo, C)


# ----------------------------------------------------------------------------
# Parameters (deterministic synthetic; eval-mode BN folded into weights/shift)
# ----------------------------------------------------------------------------
def _conv_bn_params(rng, kh, kw, cin, cout, gamma_scale=1.0):
    fan_in = kh * kw * cin
    w = rng.standard_normal((kh, kw, cin, cout)).astype(np.float32)
    w *= np.sqrt(2.0 / fan_in)
    gamma = rng.uniform(0.9, 1.1, (cout,)).astype(np.float32) * gamma_scale
    beta = 0.01 * rng.standard_normal((cout,)).astype(np.float32)
    mean = 0.01 * rng.standard_normal((cout,)).astype(np.float32)
    var = rng.uniform(0.8, 1.2, (cout,)).astype(np.float32)
    scale = gamma / np.sqrt(var + BN_EPS)
    shift = beta - mean * scale
    w_folded = w * scale[None, None, None, :]   # BN scale folded (in f32) into w
    return {
        "w": jnp.asarray(w_folded, dtype=jnp.bfloat16),  # native MXU dtype
        "shift": jnp.asarray(shift),
    }


def init_encoder_params(seed=0, layers=RESNET152_LAYERS):
    rng = np.random.default_rng(seed)
    params = {"conv1": _conv_bn_params(rng, 7, 7, 3, 64)}
    stages = []
    in_ch = 64
    for stage_idx, (width, nblocks) in enumerate(zip(STAGE_WIDTHS, layers)):
        blocks = []
        for b in range(nblocks):
            out_ch = width * EXPANSION
            blk = {
                "conv1": _conv_bn_params(rng, 1, 1, in_ch, width),
                "conv2": _conv_bn_params(rng, 3, 3, width, width),
                # small last-BN gamma keeps the deep residual stack numerically tame
                "conv3": _conv_bn_params(rng, 1, 1, width, out_ch, gamma_scale=0.1),
            }
            if b == 0:
                blk["downsample"] = _conv_bn_params(rng, 1, 1, in_ch, out_ch)
            blocks.append(blk)
            in_ch = out_ch
        stages.append(blocks)
    params["stages"] = stages
    return params


# ----------------------------------------------------------------------------
# Forward pass (matches Encoder.forward: backbone -> permute -> flatten spatial)
# ----------------------------------------------------------------------------
def encoder_forward(params, img_nchw):
    # img_nchw: (N, 3, H, W) float32, PyTorch NCHW convention
    x = jnp.transpose(img_nchw, (0, 2, 3, 1))  # -> NHWC
    p = params["conv1"]
    x = conv_bn(x, p["w"], p["shift"], stride=2, pad=3, relu=True)
    x = max_pool_3x3_s2(x)
    for stage_idx, blocks in enumerate(params["stages"]):
        for b, blk in enumerate(blocks):
            stride = 2 if (stage_idx > 0 and b == 0) else 1
            identity = x
            out = conv_bn(x, blk["conv1"]["w"], blk["conv1"]["shift"],
                          stride=1, pad=0, relu=True)
            out = conv_bn(out, blk["conv2"]["w"], blk["conv2"]["shift"],
                          stride=stride, pad=1, relu=True)
            if "downsample" in blk:
                identity = conv_bn(x, blk["downsample"]["w"],
                                   blk["downsample"]["shift"],
                                   stride=stride, pad=0, relu=False)
            # conv3 with fused residual add (f32) + ReLU epilogue, bf16 store
            x = conv_bn(out, blk["conv3"]["w"], blk["conv3"]["shift"], identity,
                        stride=1, pad=0, relu=True)
    # equivalent of feats.permute(0, 2, 3, 1).view(N, -1, C): x is already NHWC
    N, H, W, C = x.shape
    return x.reshape(N, H * W, C).astype(jnp.float32)


if __name__ == "__main__":
    key = jax.random.PRNGKey(0)
    img = jax.random.normal(key, (2, 3, 64, 64), dtype=jnp.float32)

    params = init_encoder_params(seed=0)
    feats = encoder_forward(params, img)
    feats = jax.block_until_ready(feats)

    assert feats.shape == (2, 4, 2048), feats.shape      # (N, H/32 * W/32, 2048)
    assert bool(jnp.all(jnp.isfinite(feats)))
    print("KERNEL_OK")
</pallas_src>

<mosaic_0001>
module attributes {stable_mosaic.version = 11 : i64} {
  func.func @_mm_bn_kernel(%arg0: i32, %arg1: i32, %arg2: i32, %arg3: memref<512x256xbf16, #tpu.memory_space<vmem>>, %arg4: memref<256x64xbf16, #tpu.memory_space<vmem>>, %arg5: memref<1x64xf32, #tpu.memory_space<vmem>>, %arg6: memref<512x64xbf16, #tpu.memory_space<vmem>>, %arg7: memref<512x64xf32, #tpu.memory_space<vmem>>) attributes {dimension_semantics = [#tpu.dimension_semantics<parallel>, #tpu.dimension_semantics<parallel>, #tpu.dimension_semantics<arbitrary>], iteration_bounds = array<i64: 4, 1, 1>, scalar_prefetch = 0 : i64, scratch_operands = 1 : i64, tpu.core_type = #tpu.core_type<tc>, window_params = [{transform_indices = @transform_0, window_bounds = array<i64: 512, 256>}, {transform_indices = @transform_1, window_bounds = array<i64: 256, 64>}, {transform_indices = @transform_2, window_bounds = array<i64: 1, 64>}, {transform_indices = @transform_3, window_bounds = array<i64: 512, 64>}]} {
    %c0_i32 = arith.constant 0 : i32
    %0 = arith.cmpi eq, %arg2, %c0_i32 : i32
    %1 = arith.extui %0 : i1 to i32
    %c0_i32_0 = arith.constant 0 : i32
    %2 = arith.cmpi ne, %1, %c0_i32_0 : i32
    scf.if %2 {
      %cst_10 = arith.constant 0.000000e+00 : f32
      %12 = vector.broadcast %cst_10 : f32 to vector<512x64xf32>
      %c0_11 = arith.constant 0 : index
      %c0_12 = arith.constant 0 : index
      %13 = vector.load %arg7[%c0_11, %c0_12] : memref<512x64xf32, #tpu.memory_space<vmem>>, vector<512x64xf32>
      tpu.vector_store %arg7[%c0_11, %c0_12], %12 {strides = array<i32>} : memref<512x64xf32, #tpu.memory_space<vmem>>, vector<512x64xf32>,
    } else {
    }
    %c0 = arith.constant 0 : index
    %c0_1 = arith.constant 0 : index
    %3 = vector.load %arg7[%c0, %c0_1] : memref<512x64xf32, #tpu.memory_space<vmem>>, vector<512x64xf32>
    %c0_2 = arith.constant 0 : index
    %c0_3 = arith.constant 0 : index
    %4 = vector.load %arg3[%c0_2, %c0_3] : memref<512x256xbf16, #tpu.memory_space<vmem>>, vector<512x256xbf16>
    %c0_4 = arith.constant 0 : index
    %c0_5 = arith.constant 0 : index
    %5 = vector.load %arg4[%c0_4, %c0_5] : memref<256x64xbf16, #tpu.memory_space<vmem>>, vector<256x64xbf16>
    %cst = arith.constant dense<0.000000e+00> : vector<512x64xf32>
    %6 = tpu.matmul %4, %5, %cst {dimension_numbers = #tpu.dot_dimension_numbers<[1], [0], [0], [1], [0, 0, 1, 1], [], []>} : vector<512x256xbf16>, vector<256x64xbf16>, vector<512x64xf32> -> vector<512x64xf32>
    %7 = arith.addf %3, %6 : vector<512x64xf32>
    %c0_6 = arith.constant 0 : index
    %c0_7 = arith.constant 0 : index
    %8 = vector.load %arg7[%c0_6, %c0_7] : memref<512x64xf32, #tpu.memory_space<vmem>>, vector<512x64xf32>
    tpu.vector_store %arg7[%c0_6, %c0_7], %7 {strides = array<i32>} : memref<512x64xf32, #tpu.memory_space<vmem>>, vector<512x64xf32>,
    %c0_i32_8 = arith.constant 0 : i32
    %9 = arith.cmpi eq, %arg2, %c0_i32_8 : i32
    %10 = arith.extui %9 : i1 to i32
    %c0_i32_9 = arith.constant 0 : i32
    %11 = arith.cmpi ne, %10, %c0_i32_9 : i32
    scf.if %11 {
      %c0_10 = arith.constant 0 : index
      %c0_11 = arith.constant 0 : index
      %12 = vector.load %arg7[%c0_10, %c0_11] : memref<512x64xf32, #tpu.memory_space<vmem>>, vector<512x64xf32>
      %c0_12 = arith.constant 0 : index
      %c0_13 = arith.constant 0 : index
      %13 = vector.load %arg5[%c0_12, %c0_13] : memref<1x64xf32, #tpu.memory_space<vmem>>, vector<1x64xf32>
      %14 = vector.broadcast %13 : vector<1x64xf32> to vector<512x64xf32>
      %15 = arith.addf %12, %14 : vector<512x64xf32>
      %cst_14 = arith.constant 0.000000e+00 : f32
      %16 = vector.broadcast %cst_14 : f32 to vector<512x64xf32>
      %17 = arith.maximumf %15, %16 : vector<512x64xf32>
      %18 = arith.truncf %17 : vector<512x64xf32> to vector<512x64xbf16>
      %c0_15 = arith.constant 0 : index
      %c0_16 = arith.constant 0 : index
      %19 = vector.load %arg6[%c0_15, %c0_16] : memref<512x64xbf16, #tpu.memory_space<vmem>>, vector<512x64xbf16>
      tpu.vector_store %arg6[%c0_15, %c0_16], %18 {strides = array<i32>} : memref<512x64xbf16, #tpu.memory_space<vmem>>, vector<512x64xbf16>,
    } else {
    }
    return
  }
  func.func @transform_0(%arg0: i32, %arg1: i32, %arg2: i32) -> (i32, i32) {
    %c0_i32 = arith.constant 0 : i32
    return %arg0, %arg2 : i32, i32
  }
  func.func @transform_1(%arg0: i32, %arg1: i32, %arg2: i32) -> (i32, i32) {
    %c0_i32 = arith.constant 0 : i32
    return %arg2, %arg1 : i32, i32
  }
  func.func @transform_2(%arg0: i32, %arg1: i32, %arg2: i32) -> (i32, i32) {
    %c0_i32 = arith.constant 0 : i32
    %c0_i32_0 = arith.constant 0 : i32
    return %c0_i32, %arg1 : i32, i32
  }
  func.func @transform_3(%arg0: i32, %arg1: i32, %arg2: i32) -> (i32, i32) {
    %c0_i32 = arith.constant 0 : i32
    return %arg0, %arg1 : i32, i32
  }
}

</mosaic_0001>

<bundles_post_ra>
// kernel: conv_bn.1
= control target key start
LH: loop header
LB: loop body
LE: loop exit
PB: predicated region body
PF: predicated region fallthrough
CT: control target
= control target key end

     0   :  { %8 = vsyncpa [#allocation4], 0  ;;  %s3099_s0 = inlined_call_operand.vmem [shape: bf16[2048,256], index: 0, kind: input, shape index: {}]   ;;  %s3100_s1 = inlined_call_operand.vmem [shape: bf16[256,64], index: 1, kind: input, shape index: {}]   ;;  %s3101_s2 = inlined_call_operand.vmem [shape: f32[1,64], index: 2, kind: input, shape index: {}]   ;;  %s3102_s3 = inlined_call_operand.hbm [shape: bf16[2048,64], index: 3, kind: output, shape index: {}]  }
   0x1   :  { %10 = vsyncpa [#allocation4 + $0x1], 0  ;;  %s2424_s12 = smov 0   ;;  %s2426_s13 = smov 0  }
   0x2   :  { %s2428_s14 = smov 0   ;;  %s2430_s15 = smov 0  }
   0x3   :  { %s2432_s16 = smov 0   ;;  %s2434_s17 = smov 0  }
   0x4 LB: > { %s1827_s18 = sadd.s32 4294967295, %s2399_s17   ;;  %s1828_s19 = sadd.s32 4294967294, %s2399_s17   ;;  %s2399_s17 = sphi %s2434_s17, %s16_s17   ;;  %s2395_s16 = sphi %s2432_s16, %s3109_s16   ;;  %s2391_s15 = sphi %s2430_s15, %s3108_s15   ;;  %s2387_s14 = sphi %s2428_s14, %s3107_s14   ;;  %s2383_s13 = sphi %s2426_s13, %s3106_s13   ;;  %s2379_s12 = sphi %s2424_s12, %s3105_s12  }
   0x5   : > { %s35_s20 = sadd.s32 1, %s2395_s16  ;;  %s126_s21 = sadd.s32 1, %s2387_s14 }
   0x6   : > { %p37_p0 = scmp.ge.s32.totalorder %s35_s20, 4  ;;  %p136_p1 = scmp.ne.s32.totalorder %s2387_s14, %s2383_s13 }
   0x7   : > { %p137_p2 = scmp.eq.s32.totalorder %s1827_s18, 3  ;;  %p142_p3 = scmp.ne.s32.totalorder %s2383_s13, %s2379_s12 }
   0x8   : > { %s3111_s20 = smov (%p37_p0, %s35_s20), 0  ;;  %p143_p5 = scmp.eq.s32.totalorder %s1828_s19, 3 }
   0x9   : > { %p2464_p4 = por %p137_p2, %p136_p1  ;;  %s121_s23 = ssub.s32 %s2395_s16, %s3111_s20 }
   0xa   : > { %p1833_p6 = scmp.ge.s32.totalorder %s2399_s17, 1  ;;  %p124_p7 = scmp.eq.s32.totalorder %s121_s23, 0 }
   0xb   : > { %p2471_p8 = por %p143_p5, %p142_p3  ;;  %p194_p9 = scmp.lt.s32.totalorder %s2399_s17, 5 }
   0xc   : > { %s2477_s25 = scalar_select %p124_p7, %s2387_s14, %s126_s21  }
   0xd   : > { %p195_p10 = pnand %p1833_p6, %p194_p9 }
   0xe   : > { %s1835_s11 = sshll.u32 (!%p195_p10), %s2391_s15, 6  ;;  %s231_s4 = sand.u32 (!%p195_p10), 1, %s2383_s13  }
   0xf   : > { %198 = sbr.rel (%p195_p10) target bundleno = 456 (0x1c8), region = 32  ;;  %p236_p11 = scmp.lt.s32.totalorder (!%p195_p10), %s1835_s11, 255 }
  0x10   : > { %s1834_s5 = sshll.u32 (!%p195_p10), %s231_s4, 8  ;;  %s2244_s9 = sshll.u32 (!%p195_p10), %s2391_s15, 8 }
  0x11   : > { %s2723_s6 = scalar_lea.vmem (!%p195_p10), [#allocation3], %s1834_s5  ;;  %s1700_s15 = scalar_lea.sflag (!%p195_p10), [#allocation4], %s231_s4 }
  0x12   : > { %s2341_s29 = scalar_lea.hbm (!%p195_p10), %s3102_s3, 1024 }
  0x14   : > { %v2235_v0 = vld [vmem:[%s3100_s1 + $0x38] sm:$0xff]  ;;  %v2234_v2 = vld [vmem:[%s3100_s1 + $0x30] sm:$0xff]  ;;  %v2233_v4 = vld [vmem:[%s3100_s1 + $0x28] sm:$0xff]  ;;  %s3113_s11 = smov (!%p236_p11, %s1835_s11), 255  ;;  %vm263_vm0 = vcmask 523264   ;;  %vm1634_vm1 = vcmask 519168  }
  0x15   : > { %v2243_v1 = vld [vmem:[%s3100_s1 + $0x78] sm:$0xff]  ;;  %904 = vmatpush.bf16.msra.mxu0 %v2235_v0  ;;  %2245 = vmatpush.bf16.msra.mxu2 %v2235_v0  ;;  %v2242_v3 = vld [vmem:[%s3100_s1 + $0x70] sm:$0xff]  ;;  %v2241_v5 = vld [vmem:[%s3100_s1 + $0x68] sm:$0xff]  ;;  %s2163_s7 = sshll.u32 %s3113_s11, 3  ;;  %s1713_s11 = sshll.u32 %s2723_s6, 4  ;;  %s1714_s11 = int_to_ptr.vmem [resolvable:$true] %s1713_s11 }
  0x16   : > { %1073 = vmatpush.bf16.msra.mxu1 %v2243_v1  ;;  %2253 = vmatpush.bf16.msra.mxu3 %v2243_v1  ;;  %v2232_v6 = vld [vmem:[%s3100_s1 + $0x20] sm:$0xff]  ;;  %v2231_v8 = vld [vmem:[%s3100_s1 + $0x18] sm:$0xff]  ;;  %v2230_v10 = vld [vmem:[%s3100_s1 + $0x10] sm:$0xff]  ;;  %s2522_s19 = scalar_lea.vmem %s3099_s0, %s2163_s7 }
  0x17   : > { %v2240_v7 = vld [vmem:[%s3100_s1 + $0x60] sm:$0xff]  ;;  %v2239_v9 = vld [vmem:[%s3100_s1 + $0x58] sm:$0xff]  ;;  %v2238_v11 = vld [vmem:[%s3100_s1 + $0x50] sm:$0xff] }
  0x18   : > { %v2229_v12 = vld [vmem:[%s3100_s1 + $0x8] sm:$0xff]  ;;  %v2228_v14 = vld [vmem:[%s3100_s1] sm:$0xff]  ;;  %v1848_v28 = vld [vmem:[%s2522_s19 + $0x10] sm:$0xf] }
  0x19   : > { %905 = vmatpush.bf16.msra.mxu0 %v2234_v2  ;;  %2246 = vmatpush.bf16.msra.mxu2 %v2234_v2  ;;  %v2237_v13 = vld [vmem:[%s3100_s1 + $0x48] sm:$0xff]  ;;  %v2236_v15 = vld [vmem:[%s3100_s1 + $0x40] sm:$0xff]  ;;  %v2167_v29 = vld [vmem:[%s2522_s19 + $0x14] sm:$0xf0] }
  0x1a   : > { %1074 = vmatpush.bf16.msra.mxu1 %v2242_v3  ;;  %2254 = vmatpush.bf16.msra.mxu3 %v2242_v3  ;;  %v1840_v16 = vld [vmem:[%s2522_s19] sm:$0xf]  ;;  %v2165_v17 = vld [vmem:[%s2522_s19 + $0x4] sm:$0xf0]  ;;  %v2164_v20 = vld [vmem:[%s2522_s19 + $0x4] sm:$0xf]  ;;  %v1849_v36 = vor.u32 %v2167_v29, %v1848_v28 }
  0x1b   : > { %v1968_v18 = vld [vmem:[%s2522_s19 + $0x100] sm:$0xf]  ;;  %v2197_v19 = vld [vmem:[%s2522_s19 + $0x104] sm:$0xf0]  ;;  %v1842_v21 = vld [vmem:[%s2522_s19 + $0x8] sm:$0xf0]  ;;  %v1841_v24 = vor.u32 %v2165_v17, %v1840_v16 }
  0x1c   : > { %v2196_v22 = vld [vmem:[%s2522_s19 + $0x104] sm:$0xf]  ;;  %v1970_v23 = vld [vmem:[%s2522_s19 + $0x108] sm:$0xf0]  ;;  %v1969_v25 = vor.u32 %v2197_v19, %v1968_v18  ;;  %v1845_v26 = vor.u32 %v2164_v20, %v1842_v21  ;;  %v1976_v30 = vld [vmem:[%s2522_s19 + $0x110] sm:$0xf] }
  0x1d   : > { %906 = vmatpush.bf16.msra.mxu0 %v2233_v4  ;;  %2247 = vmatpush.bf16.msra.mxu2 %v2233_v4  ;;  %v1973_v27 = vor.u32 %v2196_v22, %v1970_v23  ;;  %v2199_v31 = vld [vmem:[%s2522_s19 + $0x114] sm:$0xf0]  ;;  %v2166_v32 = vld [vmem:[%s2522_s19 + $0x14] sm:$0xf]  ;;  %v1850_v33 = vld [vmem:[%s2522_s19 + $0x18] sm:$0xf0] }
  0x1e   : > { %1075 = vmatpush.bf16.msra.mxu1 %v2241_v5  ;;  %2255 = vmatpush.bf16.msra.mxu3 %v2241_v5  ;;  %v2198_v34 = vld [vmem:[%s2522_s19 + $0x114] sm:$0xf]  ;;  %v1978_v35 = vld [vmem:[%s2522_s19 + $0x118] sm:$0xf0]  ;;  %v1977_v37 = vor.u32 %v2199_v31, %v1976_v30  ;;  %v1853_v38 = vor.u32 %v2166_v32, %v1850_v33  ;;  %v1856_v40 = vld [vmem:[%s2522_s19 + $0x20] sm:$0xf] }
  0x1f   : > { %v1981_v39 = vor.u32 %v2198_v34, %v1978_v35  ;;  %v2169_v41 = vld [vmem:[%s2522_s19 + $0x24] sm:$0xf0]  ;;  %v1984_v42 = vld [vmem:[%s2522_s19 + $0x120] sm:$0xf]  ;;  %v2168_v44 = vld [vmem:[%s2522_s19 + $0x24] sm:$0xf] }
  0x20   : > { %v2201_v43 = vld [vmem:[%s2522_s19 + $0x124] sm:$0xf0]  ;;  %v1858_v45 = vld [vmem:[%s2522_s19 + $0x28] sm:$0xf0]  ;;  %v2200_v46 = vld [vmem:[%s2522_s19 + $0x124] sm:$0xf]  ;;  %v1857_v48 = vor.u32 %v2169_v41, %v1856_v40 }
  0x21   : > { %907 = vmatpush.bf16.msra.mxu0 %v2232_v6  ;;  %2248 = vmatpush.bf16.msra.mxu2 %v2232_v6  ;;  %v1986_v47 = vld [vmem:[%s2522_s19 + $0x128] sm:$0xf0]  ;;  %v1985_v49 = vor.u32 %v2201_v43, %v1984_v42  ;;  %v1861_v50 = vor.u32 %v2168_v44, %v1858_v45  ;;  %v1864_v52 = vld [vmem:[%s2522_s19 + $0x30] sm:$0xf]  ;;  %v2171_v53 = vld [vmem:[%s2522_s19 + $0x34] sm:$0xf0] }
  0x22   : > { %1076 = vmatpush.bf16.msra.mxu1 %v2240_v7  ;;  %2256 = vmatpush.bf16.msra.mxu3 %v2240_v7  ;;  %v1989_v51 = vor.u32 %v2200_v46, %v1986_v47  ;;  %v1992_v54 = vld [vmem:[%s2522_s19 + $0x130] sm:$0xf]  ;;  %v2203_v55 = vld [vmem:[%s2522_s19 + $0x134] sm:$0xf0]  ;;  %v2170_v56 = vld [vmem:[%s2522_s19 + $0x34] sm:$0xf]  ;;  %v1865_v60 = vor.u32 %v2171_v53, %v1864_v52 }
  0x23   : > { %v1866_v57 = vld [vmem:[%s2522_s19 + $0x38] sm:$0xf0]  ;;  %v2202_v58 = vld [vmem:[%s2522_s19 + $0x134] sm:$0xf]  ;;  %v1993_v61 = vor.u32 %v2203_v55, %v1992_v54  ;;  %v1872_v0 = vld [vmem:[%s2522_s19 + $0x40] sm:$0xf] }
  0x24   : > { %v1994_v59 = vld [vmem:[%s2522_s19 + $0x138] sm:$0xf0]  ;;  %v1869_v62 = vor.u32 %v2170_v56, %v1866_v57  ;;  %v2173_v1 = vld [vmem:[%s2522_s19 + $0x44] sm:$0xf0]  ;;  %v2000_v2 = vld [vmem:[%s2522_s19 + $0x140] sm:$0xf] }
  0x25   : > { %908 = vmatpush.bf16.msra.mxu0 %v2231_v8  ;;  %2249 = vmatpush.bf16.msra.mxu2 %v2231_v8  ;;  %v1997_v63 = vor.u32 %v2202_v58, %v1994_v59  ;;  %v2205_v3 = vld [vmem:[%s2522_s19 + $0x144] sm:$0xf0]  ;;  %v2172_v4 = vld [vmem:[%s2522_s19 + $0x44] sm:$0xf]  ;;  %v1874_v5 = vld [vmem:[%s2522_s19 + $0x48] sm:$0xf0]  ;;  %v1873_v8 = vor.u32 %v2173_v1, %v1872_v0 }
  0x26   : > { %1077 = vmatpush.bf16.msra.mxu1 %v2239_v9  ;;  %2257 = vmatpush.bf16.msra.mxu3 %v2239_v9  ;;  %v2204_v6 = vld [vmem:[%s2522_s19 + $0x144] sm:$0xf]  ;;  %v2002_v7 = vld [vmem:[%s2522_s19 + $0x148] sm:$0xf0]  ;;  %v2001_v9 = vor.u32 %v2205_v3, %v2000_v2  ;;  %v2174_v16 = vld [vmem:[%s2522_s19 + $0x54] sm:$0xf] }
  0x27   : > { %v1882_v17 = vld [vmem:[%s2522_s19 + $0x58] sm:$0xf0]  ;;  %v2206_v18 = vld [vmem:[%s2522_s19 + $0x154] sm:$0xf]  ;;  %v2176_v28 = vld [vmem:[%s2522_s19 + $0x64] sm:$0xf] }
  0x28   : > { %v2010_v19 = vld [vmem:[%s2522_s19 + $0x158] sm:$0xf0]  ;;  %v1885_v22 = vor.u32 %v2174_v16, %v1882_v17  ;;  %v1890_v29 = vld [vmem:[%s2522_s19 + $0x68] sm:$0xf0]  ;;  %v2208_v30 = vld [vmem:[%s2522_s19 + $0x164] sm:$0xf] }
  0x29   : > { %909 = vmatpush.bf16.msra.mxu0 %v2230_v10  ;;  %2250 = vmatpush.bf16.msra.mxu2 %v2230_v10  ;;  %v1877_v10 = vor.u32 %v2172_v4, %v1874_v5  ;;  %v2013_v23 = vor.u32 %v2206_v18, %v2010_v19  ;;  %v2018_v31 = vld [vmem:[%s2522_s19 + $0x168] sm:$0xf0]  ;;  %v1893_v34 = vor.u32 %v2176_v28, %v1890_v29  ;;  %v2211_v40 = vld [vmem:[%s2522_s19 + $0x174] sm:$0xf0]  ;;  %v2178_v41 = vld [vmem:[%s2522_s19 + $0x74] sm:$0xf] }
  0x2a   : > { %1078 = vmatpush.bf16.msra.mxu1 %v2238_v11  ;;  %2258 = vmatpush.bf16.msra.mxu3 %v2238_v11  ;;  %v2005_v11 = vor.u32 %v2204_v6, %v2002_v7  ;;  %v2021_v35 = vor.u32 %v2208_v30, %v2018_v31  ;;  %v1898_v42 = vld [vmem:[%s2522_s19 + $0x78] sm:$0xf0]  ;;  %v2210_v43 = vld [vmem:[%s2522_s19 + $0x174] sm:$0xf]  ;;  %v2213_v52 = vld [vmem:[%s2522_s19 + $0x184] sm:$0xf0] }
  0x2b   : > { %v2026_v44 = vld [vmem:[%s2522_s19 + $0x178] sm:$0xf0]  ;;  %v1901_v47 = vor.u32 %v2178_v41, %v1898_v42  ;;  %v2180_v53 = vld [vmem:[%s2522_s19 + $0x84] sm:$0xf]  ;;  %v1906_v54 = vld [vmem:[%s2522_s19 + $0x88] sm:$0xf0] }
  0x2c   : > { %v2212_v55 = vld [vmem:[%s2522_s19 + $0x184] sm:$0xf]  ;;  %v2034_v56 = vld [vmem:[%s2522_s19 + $0x188] sm:$0xf0]  ;;  %v2687_v5 = vld [vmem:[%s3101_s2] ss:$0 sm:$0xff] }
  0x2d   : > { %910 = vmatpush.bf16.msra.mxu0 %v2229_v12  ;;  %2251 = vmatpush.bf16.msra.mxu2 %v2229_v12  ;;  %v1880_v12 = vld [vmem:[%s2522_s19 + $0x50] sm:$0xf]  ;;  %v1920_v31 = vld [vmem:[%s2522_s19 + $0xa0] sm:$0xf] }
  0x2e   : > { %1079 = vmatpush.bf16.msra.mxu1 %v2237_v13  ;;  %2259 = vmatpush.bf16.msra.mxu3 %v2237_v13  ;;  %v2175_v13 = vld [vmem:[%s2522_s19 + $0x54] sm:$0xf0]  ;;  %v1912_v7 = vld [vmem:[%s2522_s19 + $0x90] sm:$0xf] }
  0x2f   : > { %v1881_v20 = vor.u32 %v2175_v13, %v1880_v12  ;;  %v1914_v12 = vld [vmem:[%s2522_s19 + $0x98] sm:$0xf0] }
  0x31   : > { %911 = vmatpush.bf16.msra.mxu0 %v2228_v14  ;;  %2252 = vmatpush.bf16.msra.mxu2 %v2228_v14  ;;  %v2008_v14 = vld [vmem:[%s2522_s19 + $0x150] sm:$0xf] }
  0x32   : > { %1080 = vmatpush.bf16.msra.mxu1 %v2236_v15  ;;  %2260 = vmatpush.bf16.msra.mxu3 %v2236_v15  ;;  %v2207_v15 = vld [vmem:[%s2522_s19 + $0x154] sm:$0xf0] }
  0x33   : > { %v2009_v21 = vor.u32 %v2207_v15, %v2008_v14  ;;  %v2214_v14 = vld [vmem:[%s2522_s19 + $0x194] sm:$0xf]  ;;  %v2042_v15 = vld [vmem:[%s2522_s19 + $0x198] sm:$0xf0] }
  0x34   : > { %912 = vmatmul.bf16.vlgmr.msra.gmra.mxu0 %v1841_v24  ;;  %992 = vmatmul.bf16.vlgmr.msra.gmra.mxu2 %v1969_v25  ;;  %v1888_v24 = vld [vmem:[%s2522_s19 + $0x60] sm:$0xf]  ;;  %v2177_v25 = vld [vmem:[%s2522_s19 + $0x64] sm:$0xf0] }
  0x35   : > { %1081 = vmatmul.bf16.vlgmr.msra.gmra.mxu1 %v1845_v26  ;;  %1161 = vmatmul.bf16.vlgmr.msra.gmra.mxu3 %v1973_v27  ;;  %v2016_v26 = vld [vmem:[%s2522_s19 + $0x160] sm:$0xf]  ;;  %v2209_v27 = vld [vmem:[%s2522_s19 + $0x164] sm:$0xf0]  ;;  %v1889_v32 = vor.u32 %v2177_v25, %v1888_v24  ;;  %v2045_v24 = vor.u32 %v2214_v14, %v2042_v15 }
  0x36   : > { %v2017_v33 = vor.u32 %v2209_v27, %v2016_v26 }
  0x44   : > { %917 = vmatmul.bf16.gmra.mxu0 %v1849_v36  ;;  %997 = vmatmul.bf16.gmra.mxu2 %v1977_v37  ;;  %v2401_v36 = vmov 0.0   ;;  %v1896_v37 = vld [vmem:[%s2522_s19 + $0x70] sm:$0xf] }
  0x45   : > { %1086 = vmatmul.bf16.gmra.mxu1 %v1853_v38  ;;  %1166 = vmatmul.bf16.gmra.mxu3 %v1981_v39  ;;  %264 = vst.msk [vmem:[#allocation2] sm:$0xff] %vm263_vm0, %v2401_v36  ;;  %v2179_v38 = vld [vmem:[%s2522_s19 + $0x74] sm:$0xf0]  ;;  %v2024_v39 = vld [vmem:[%s2522_s19 + $0x170] sm:$0xf] }
  0x46   : > { %265 = vst.msk [vmem:[#allocation2 + $0x8] sm:$0xff] %vm263_vm0, %v2401_v36  ;;  %v1897_v45 = vor.u32 %v2179_v38, %v1896_v37  ;;  %v2025_v46 = vor.u32 %v2211_v40, %v2024_v39  ;;  %v2184_v39 = vld [vmem:[%s2522_s19 + $0xa4] sm:$0xf]  ;;  %v1922_v40 = vld [vmem:[%s2522_s19 + $0xa8] sm:$0xf0] }
  0x47   : > { %266 = vst.msk [vmem:[#allocation2 + $0x10] sm:$0xff] %vm263_vm0, %v2401_v36 }
  0x48   : > { %267 = vst.msk [vmem:[#allocation2 + $0x18] sm:$0xff] %vm263_vm0, %v2401_v36 }
  0x49   : > { %268 = vst.msk [vmem:[#allocation2 + $0x20] sm:$0xff] %vm263_vm0, %v2401_v36 }
  0x4a   : > { %269 = vst.msk [vmem:[#allocation2 + $0x28] sm:$0xff] %vm263_vm0, %v2401_v36 }
  0x4b   : > { %270 = vst.msk [vmem:[#allocation2 + $0x30] sm:$0xff] %vm263_vm0, %v2401_v36 }
  0x4c   : > { %271 = vst.msk [vmem:[#allocation2 + $0x38] sm:$0xff] %vm263_vm0, %v2401_v36 }
  0x4d   : > { %272 = vst.msk [vmem:[#allocation2 + $0x40] sm:$0xff] %vm263_vm0, %v2401_v36  ;;  %v329_v41 = vld [vmem:[#allocation2 + $0x8] sm:$0xff] }
  0x4e   : > { %273 = vst.msk [vmem:[#allocation2 + $0x48] sm:$0xff] %vm263_vm0, %v2401_v36 }
  0x4f   : > { %274 = vst.msk [vmem:[#allocation2 + $0x50] sm:$0xff] %vm263_vm0, %v2401_v36 }
  0x50   : > { %275 = vst.msk [vmem:[#allocation2 + $0x58] sm:$0xff] %vm263_vm0, %v2401_v36 }
  0x51   : > { %276 = vst.msk [vmem:[#allocation2 + $0x60] sm:$0xff] %vm263_vm0, %v2401_v36 }
  0x52   : > { %277 = vst.msk [vmem:[#allocation2 + $0x68] sm:$0xff] %vm263_vm0, %v2401_v36 }
  0x53   : > { %278 = vst.msk [vmem:[#allocation2 + $0x70] sm:$0xff] %vm263_vm0, %v2401_v36 }
  0x54   : > { %922 = vmatmul.bf16.gmra.mxu0 %v1857_v48  ;;  %1002 = vmatmul.bf16.gmra.mxu2 %v1985_v49  ;;  %v2029_v48 = vor.u32 %v2210_v43, %v2026_v44  ;;  %279 = vst.msk [vmem:[#allocation2 + $0x78] sm:$0xff] %vm263_vm0, %v2401_v36  ;;  %v1904_v49 = vld [vmem:[%s2522_s19 + $0x80] sm:$0xf]  ;;  %v2216_v43 = vld [vmem:[%s2522_s19 + $0x1a4] sm:$0xf] }
  0x55   : > { %1091 = vmatmul.bf16.gmra.mxu1 %v1861_v50  ;;  %1171 = vmatmul.bf16.gmra.mxu3 %v1989_v51  ;;  %280 = vst.msk [vmem:[#allocation2 + $0x80] sm:$0xff] %vm263_vm0, %v2401_v36  ;;  %v2181_v50 = vld [vmem:[%s2522_s19 + $0x84] sm:$0xf0]  ;;  %v2032_v51 = vld [vmem:[%s2522_s19 + $0x180] sm:$0xf] }
  0x56   : > { %281 = vst.msk [vmem:[#allocation2 + $0x88] sm:$0xff] %vm263_vm0, %v2401_v36  ;;  %v1905_v57 = vor.u32 %v2181_v50, %v1904_v49  ;;  %v2033_v58 = vor.u32 %v2213_v52, %v2032_v51  ;;  %v2050_v44 = vld [vmem:[%s2522_s19 + $0x1a8] sm:$0xf0]  ;;  %v330_v49 = vld [vmem:[#allocation2 + $0x10] sm:$0xff] }
  0x57   : > { %282 = vst.msk [vmem:[#allocation2 + $0x90] sm:$0xff] %vm263_vm0, %v2401_v36 }
  0x58   : > { %283 = vst.msk [vmem:[#allocation2 + $0x98] sm:$0xff] %vm263_vm0, %v2401_v36 }
  0x59   : > { %284 = vst.msk [vmem:[#allocation2 + $0xa0] sm:$0xff] %vm263_vm0, %v2401_v36 }
  0x5a   : > { %285 = vst.msk [vmem:[#allocation2 + $0xa8] sm:$0xff] %vm263_vm0, %v2401_v36 }
  0x5b   : > { %286 = vst.msk [vmem:[#allocation2 + $0xb0] sm:$0xff] %vm263_vm0, %v2401_v36 }
  0x5c   : > { %287 = vst.msk [vmem:[#allocation2 + $0xb8] sm:$0xff] %vm263_vm0, %v2401_v36 }
  0x5d   : > { %288 = vst.msk [vmem:[#allocation2 + $0xc0] sm:$0xff] %vm263_vm0, %v2401_v36 }
  0x5e   : > { %289 = vst.msk [vmem:[#allocation2 + $0xc8] sm:$0xff] %vm263_vm0, %v2401_v36 }
  0x5f   : > { %290 = vst.msk [vmem:[#allocation2 + $0xd0] sm:$0xff] %vm263_vm0, %v2401_v36 }
  0x60   : > { %291 = vst.msk [vmem:[#allocation2 + $0xd8] sm:$0xff] %vm263_vm0, %v2401_v36 }
  0x61   : > { %292 = vst.msk [vmem:[#allocation2 + $0xe0] sm:$0xff] %vm263_vm0, %v2401_v36 }
  0x62   : > { %293 = vst.msk [vmem:[#allocation2 + $0xe8] sm:$0xff] %vm263_vm0, %v2401_v36 }
  0x63   : > { %294 = vst.msk [vmem:[#allocation2 + $0xf0] sm:$0xff] %vm263_vm0, %v2401_v36 }
  0x64   : > { %927 = vmatmul.bf16.gmra.mxu0 %v1865_v60  ;;  %1007 = vmatmul.bf16.gmra.mxu2 %v1993_v61  ;;  %295 = vst.msk [vmem:[#allocation2 + $0xf8] sm:$0xff] %vm263_vm0, %v2401_v36  ;;  %v1909_v60 = vor.u32 %v2180_v53, %v1906_v54  ;;  %v2037_v61 = vor.u32 %v2212_v55, %v2034_v56 }
  0x65   : > { %1096 = vmatmul.bf16.gmra.mxu1 %v1869_v62  ;;  %1176 = vmatmul.bf16.gmra.mxu3 %v1997_v63  ;;  %v328_v62 = vld [vmem:[#allocation2] sm:$0xff]  ;;  %296 = vst.msk [vmem:[#allocation2 + $0x100] sm:$0xff] %vm263_vm0, %v2401_v36 }
  0x66   : > { %297 = vst.msk [vmem:[#allocation2 + $0x108] sm:$0xff] %vm263_vm0, %v2401_v36 }
  0x67   : > { %298 = vst.msk [vmem:[#allocation2 + $0x110] sm:$0xff] %vm263_vm0, %v2401_v36 }
  0x68   : > { %299 = vst.msk [vmem:[#allocation2 + $0x118] sm:$0xff] %vm263_vm0, %v2401_v36 }
  0x69   : > { %300 = vst.msk [vmem:[#allocation2 + $0x120] sm:$0xff] %vm263_vm0, %v2401_v36 }
  0x6a   : > { %301 = vst.msk [vmem:[#allocation2 + $0x128] sm:$0xff] %vm263_vm0, %v2401_v36 }
  0x6b   : > { %302 = vst.msk [vmem:[#allocation2 + $0x130] sm:$0xff] %vm263_vm0, %v2401_v36 }
  0x6c   : > { %303 = vst.msk [vmem:[#allocation2 + $0x138] sm:$0xff] %vm263_vm0, %v2401_v36  ;;  %v360_v37 = vld [vmem:[#allocation2 + $0x100] sm:$0xff] }
  0x6d   : > { %304 = vst.msk [vmem:[#allocation2 + $0x140] sm:$0xff] %vm263_vm0, %v2401_v36 }
  0x6e   : > { %305 = vst.msk [vmem:[#allocation2 + $0x148] sm:$0xff] %vm263_vm0, %v2401_v36  ;;  %v362_v55 = vld [vmem:[#allocation2 + $0x110] sm:$0xff] }
  0x6f   : > { %306 = vst.msk [vmem:[#allocation2 + $0x150] sm:$0xff] %vm263_vm0, %v2401_v36 }
  0x70   : > { %307 = vst.msk [vmem:[#allocation2 + $0x158] sm:$0xff] %vm263_vm0, %v2401_v36 }
  0x71   : > { %308 = vst.msk [vmem:[#allocation2 + $0x160] sm:$0xff] %vm263_vm0, %v2401_v36 }
  0x72   : > { %309 = vst.msk [vmem:[#allocation2 + $0x168] sm:$0xff] %vm263_vm0, %v2401_v36 }
  0x73   : > { %310 = vst.msk [vmem:[#allocation2 + $0x170] sm:$0xff] %vm263_vm0, %v2401_v36 }
  0x74   : > { %932 = vmatmul.bf16.gmra.mxu0 %v1873_v8  ;;  %1012 = vmatmul.bf16.gmra.mxu2 %v2001_v9  ;;  %v2183_v8 = vld [vmem:[%s2522_s19 + $0x94] sm:$0xf0]  ;;  %v2040_v9 = vld [vmem:[%s2522_s19 + $0x190] sm:$0xf]  ;;  %311 = vst.msk [vmem:[#allocation2 + $0x178] sm:$0xff] %vm263_vm0, %v2401_v36 }
  0x75   : > { %1101 = vmatmul.bf16.gmra.mxu1 %v1877_v10  ;;  %1181 = vmatmul.bf16.gmra.mxu3 %v2005_v11  ;;  %v2215_v10 = vld [vmem:[%s2522_s19 + $0x194] sm:$0xf0]  ;;  %v2182_v11 = vld [vmem:[%s2522_s19 + $0x94] sm:$0xf]  ;;  %v1913_v19 = vor.u32 %v2183_v8, %v1912_v7  ;;  %312 = vst.msk [vmem:[#allocation2 + $0x180] sm:$0xff] %vm263_vm0, %v2401_v36 }
  0x76   : > { %313 = vst.msk [vmem:[#allocation2 + $0x188] sm:$0xff] %vm263_vm0, %v2401_v36 }
  0x77   : > { %314 = vst.msk [vmem:[#allocation2 + $0x190] sm:$0xff] %vm263_vm0, %v2401_v36 }
  0x78   : > { %315 = vst.msk [vmem:[#allocation2 + $0x198] sm:$0xff] %vm263_vm0, %v2401_v36 }
  0x79   : > { %316 = vst.msk [vmem:[#allocation2 + $0x1a0] sm:$0xff] %vm263_vm0, %v2401_v36 }
  0x7a   : > { %317 = vst.msk [vmem:[#allocation2 + $0x1a8] sm:$0xff] %vm263_vm0, %v2401_v36 }
  0x7b   : > { %318 = vst.msk [vmem:[#allocation2 + $0x1b0] sm:$0xff] %vm263_vm0, %v2401_v36 }
  0x7c   : > { %319 = vst.msk [vmem:[#allocation2 + $0x1b8] sm:$0xff] %vm263_vm0, %v2401_v36 }
  0x7d   : > { %320 = vst.msk [vmem:[#allocation2 + $0x1c0] sm:$0xff] %vm263_vm0, %v2401_v36 }
  0x7e   : > { %321 = vst.msk [vmem:[#allocation2 + $0x1c8] sm:$0xff] %vm263_vm0, %v2401_v36 }
  0x7f   : > { %322 = vst.msk [vmem:[#allocation2 + $0x1d0] sm:$0xff] %vm263_vm0, %v2401_v36 }
  0x80   : > { %323 = vst.msk [vmem:[#allocation2 + $0x1d8] sm:$0xff] %vm263_vm0, %v2401_v36 }
  0x81   : > { %324 = vst.msk [vmem:[#allocation2 + $0x1e0] sm:$0xff] %vm263_vm0, %v2401_v36 }
  0x82   : > { %325 = vst.msk [vmem:[#allocation2 + $0x1e8] sm:$0xff] %vm263_vm0, %v2401_v36 }
  0x83   : > { %326 = vst.msk [vmem:[#allocation2 + $0x1f0] sm:$0xff] %vm263_vm0, %v2401_v36 }
  0x84   : > { %937 = vmatmul.bf16.gmra.mxu0 %v1881_v20  ;;  %1017 = vmatmul.bf16.gmra.mxu2 %v2009_v21  ;;  %v2041_v20 = vor.u32 %v2215_v10, %v2040_v9  ;;  %327 = vst.msk [vmem:[#allocation2 + $0x1f8] sm:$0xff] %vm263_vm0, %v2401_v36  ;;  %v364_v9 = vld [vmem:[#allocation2 + $0x120] sm:$0xff] }
  0x85   : > { %1106 = vmatmul.bf16.gmra.mxu1 %v1885_v22  ;;  %1186 = vmatmul.bf16.gmra.mxu3 %v2013_v23  ;;  %v1917_v23 = vor.u32 %v2182_v11, %v1914_v12 }
  0x94   : > { %942 = vmatmul.bf16.gmra.mxu0 %v1889_v32  ;;  %1022 = vmatmul.bf16.gmra.mxu2 %v2017_v33  ;;  %v2185_v32 = vld [vmem:[%s2522_s19 + $0xa4] sm:$0xf0] }
  0x95   : > { %1111 = vmatmul.bf16.gmra.mxu1 %v1893_v34  ;;  %1191 = vmatmul.bf16.gmra.mxu3 %v2021_v35  ;;  %v2048_v34 = vld [vmem:[%s2522_s19 + $0x1a0] sm:$0xf]  ;;  %v2217_v35 = vld [vmem:[%s2522_s19 + $0x1a4] sm:$0xf0]  ;;  %v1921_v52 = vor.u32 %v2185_v32, %v1920_v31  ;;  %v2218_v32 = vld [vmem:[%s2522_s19 + $0x1b4] sm:$0xf] }
  0x96   : > { %v2049_v53 = vor.u32 %v2217_v35, %v2048_v34 }
  0xa4   : > { %947 = vmatmul.bf16.gmra.mxu0 %v1897_v45  ;;  %1027 = vmatmul.bf16.gmra.mxu2 %v2025_v46  ;;  %v361_v45 = vld [vmem:[#allocation2 + $0x108] sm:$0xff] }
  0xa5   : > { %1116 = vmatmul.bf16.gmra.mxu1 %v1901_v47  ;;  %1196 = vmatmul.bf16.gmra.mxu3 %v2029_v48 }
  0xb1   : > { %v913_v59 = vpop.f32.mrf.mxu0 }
  0xb2   : > { %v1082_v63 = vpop.f32.mrf.mxu1 }
  0xb3   : > { %v1083_v0 = vadd.f32 %v1082_v63, %v913_v59  ;;  %v2053_v59 = vor.u32 %v2216_v43, %v2050_v44 }
  0xb4   : > { %952 = vmatmul.bf16.gmra.mxu0 %v1905_v57  ;;  %1032 = vmatmul.bf16.gmra.mxu2 %v2033_v58  ;;  %v1925_v58 = vor.u32 %v2184_v39, %v1922_v40 }
  0xb5   : > { %v1242_v1 = vadd.f32 %v1083_v0, %v328_v62  ;;  %1121 = vmatmul.bf16.gmra.mxu1 %v1909_v60  ;;  %1201 = vmatmul.bf16.gmra.mxu3 %v2037_v61  ;;  %v331_v61 = vld [vmem:[#allocation2 + $0x18] sm:$0xff] }
  0xb7   : > { %1307 = vst.msk [vmem:[#allocation2] sm:$0xff] %vm263_vm0, %v1242_v1  ;;  %v993_v2 = vpop.f32.mrf.mxu2  ;;  %v363_v1 = vld [vmem:[#allocation2 + $0x118] sm:$0xff] }
  0xb8   : > { %v1162_v3 = vpop.f32.mrf.mxu3 }
  0xb9   : > { %v915_v4 = vpop.f32.mrf.mxu0  ;;  %v1163_v33 = vadd.f32 %v1162_v3, %v993_v2 }
  0xba   : > { %v1084_v6 = vpop.f32.mrf.mxu1 }
  0xbb   : > { %v1085_v38 = vadd.f32 %v1084_v6, %v915_v4  ;;  %v1274_v48 = vadd.f32 %v1163_v33, %v360_v37  ;;  %v332_v4 = vld [vmem:[#allocation2 + $0x20] sm:$0xff]  ;;  %v2058_v33 = vld [vmem:[%s2522_s19 + $0x1b8] sm:$0xf0] }
  0xbd   : > { %v1243_v54 = vadd.f32 %v1085_v38, %v329_v41  ;;  %1339 = vst.msk [vmem:[#allocation2 + $0x100] sm:$0xff] %vm263_vm0, %v1274_v48 }
  0xbe   : > { %v1374_v13 = vld [vmem:[#allocation2] sm:$0xff] }
  0xbf   : > { %v1442_v16 = vadd.f32 %v2687_v5, %v1374_v13  ;;  %v995_v17 = vpop.f32.mrf.mxu2  ;;  %1308 = vst.msk [vmem:[#allocation2 + $0x8] sm:$0xff] %vm263_vm0, %v1243_v54  ;;  %v333_v13 = vld [vmem:[#allocation2 + $0x28] sm:$0xff] }
  0xc0   : > { %v1164_v18 = vpop.f32.mrf.mxu3 }
  0xc1   : > { %v1506_v21 = vmax.f32 %v1442_v16, 0.0  ;;  %v918_v22 = vpop.f32.mrf.mxu0  ;;  %v1165_v42 = vadd.f32 %v1164_v18, %v995_v17  ;;  %v1928_v18 = vld [vmem:[%s2522_s19 + $0xb0] sm:$0xf] }
  0xc2   : > { %v1087_v25 = vpop.f32.mrf.mxu1 }
  0xc3   : > { %v1570_v26 = vpack.c.bf16 %v1506_v21, %v1506_v21  ;;  %v1088_v46 = vadd.f32 %v1087_v25, %v918_v22  ;;  %v1275_v60 = vadd.f32 %v1165_v42, %v361_v45  ;;  %v2056_v22 = vld [vmem:[%s2522_s19 + $0x1b0] sm:$0xf] }
  0xc4   : > { %957 = vmatmul.bf16.gmra.mxu0 %v1913_v19  ;;  %1037 = vmatmul.bf16.gmra.mxu2 %v2041_v20  ;;  %v1406_v15 = vld [vmem:[#allocation2 + $0x100] sm:$0xff]  ;;  %v2187_v19 = vld [vmem:[%s2522_s19 + $0xb4] sm:$0xf0] }
  0xc5   : > { %1635 = vst.msk [vmem:[%s2723_s6] sm:$0xf] %vm1634_vm1, %v1570_v26  ;;  %1126 = vmatmul.bf16.gmra.mxu1 %v1917_v23  ;;  %1206 = vmatmul.bf16.gmra.mxu3 %v2045_v24  ;;  %v1244_v0 = vadd.f32 %v1088_v46, %v330_v49  ;;  %v1474_v20 = vadd.f32 %v2687_v5, %v1406_v15  ;;  %v2219_v23 = vld [vmem:[%s2522_s19 + $0x1b4] sm:$0xf0]  ;;  %v366_v15 = vld [vmem:[#allocation2 + $0x130] sm:$0xff] }
  0xc6   : > { %1340 = vst.msk [vmem:[#allocation2 + $0x108] sm:$0xff] %vm263_vm0, %v1275_v60  ;;  %v1375_v21 = vld [vmem:[#allocation2 + $0x8] sm:$0xff]  ;;  %v1929_v39 = vor.u32 %v2187_v19, %v1928_v18  ;;  %v2057_v40 = vor.u32 %v2219_v23, %v2056_v22 }
  0xc7   : > { %v998_v27 = vpop.f32.mrf.mxu2  ;;  %1309 = vst.msk [vmem:[#allocation2 + $0x10] sm:$0xff] %vm263_vm0, %v1244_v0  ;;  %v1443_v24 = vadd.f32 %v2687_v5, %v1375_v21  ;;  %v335_v21 = vld [vmem:[#allocation2 + $0x38] sm:$0xff] }
  0xc8   : > { %v1167_v28 = vpop.f32.mrf.mxu3 }
  0xc9   : > { %v920_v29 = vpop.f32.mrf.mxu0  ;;  %v1168_v50 = vadd.f32 %v1167_v28, %v998_v27  ;;  %v2186_v27 = vld [vmem:[%s2522_s19 + $0xb4] sm:$0xf]  ;;  %v1930_v28 = vld [vmem:[%s2522_s19 + $0xb8] sm:$0xf0]  ;;  %v1507_v34 = vmax.f32 %v1443_v24, 0.0 }
  0xca   : > { %v1089_v30 = vpop.f32.mrf.mxu1  ;;  %v1933_v46 = vor.u32 %v2186_v27, %v1930_v28  ;;  %v2189_v27 = vld [vmem:[%s2522_s19 + $0xc4] sm:$0xf0]  ;;  %v2064_v28 = vld [vmem:[%s2522_s19 + $0x1c0] sm:$0xf] }
  0xcb   : > { %v1090_v56 = vadd.f32 %v1089_v30, %v920_v29  ;;  %v1276_v3 = vadd.f32 %v1168_v50, %v362_v55  ;;  %v1538_v29 = vmax.f32 %v1474_v20, 0.0 }
  0xcd   : > { %v1245_v6 = vadd.f32 %v1090_v56, %v331_v61  ;;  %1341 = vst.msk [vmem:[#allocation2 + $0x110] sm:$0xff] %vm263_vm0, %v1276_v3  ;;  %v1407_v25 = vld [vmem:[#allocation2 + $0x108] sm:$0xff]  ;;  %v1602_v41 = vpack.c.bf16 %v1538_v29, %v1538_v29 }
  0xce   : > { %v1475_v30 = vadd.f32 %v2687_v5, %v1407_v25  ;;  %v1376_v31 = vld [vmem:[#allocation2 + $0x10] sm:$0xff]  ;;  %v2221_v29 = vld [vmem:[%s2522_s19 + $0x1c4] sm:$0xf0] }
  0xcf   : > { %v1000_v47 = vpop.f32.mrf.mxu2  ;;  %1310 = vst.msk [vmem:[#allocation2 + $0x18] sm:$0xff] %vm263_vm0, %v1245_v6  ;;  %v1444_v35 = vadd.f32 %v2687_v5, %v1376_v31  ;;  %v2188_v31 = vld [vmem:[%s2522_s19 + $0xc4] sm:$0xf] }
  0xd0   : > { %v1169_v51 = vpop.f32.mrf.mxu3  ;;  %v1539_v42 = vmax.f32 %v1475_v30, 0.0  ;;  %1667 = vst.msk [vmem:[%s2723_s6 + $0x80] sm:$0xf] %vm1634_vm1, %v1602_v41 }
  0xd1   : > { %v923_v57 = vpop.f32.mrf.mxu0  ;;  %v1170_v62 = vadd.f32 %v1169_v51, %v1000_v47  ;;  %v1571_v47 = vpack.c.bf16 %v1507_v34, %v1507_v34  ;;  %v1508_v48 = vmax.f32 %v1444_v35, 0.0  ;;  %v2066_v34 = vld [vmem:[%s2522_s19 + $0x1c8] sm:$0xf0] }
  0xd2   : > { %v1092_v63 = vpop.f32.mrf.mxu1 }
  0xd3   : > { %v1093_v2 = vadd.f32 %v1092_v63, %v923_v57  ;;  %v1277_v7 = vadd.f32 %v1170_v62, %v363_v1  ;;  %1636 = vst.msk [vmem:[%s2723_s6 + $0x4] sm:$0xf] %vm1634_vm1, %v1571_v47  ;;  %v365_v62 = vld [vmem:[#allocation2 + $0x128] sm:$0xff]  ;;  %v336_v47 = vld [vmem:[#allocation2 + $0x40] sm:$0xff] }
  0xd4   : > { %962 = vmatmul.bf16.gmra.mxu0 %v1921_v52  ;;  %1042 = vmatmul.bf16.gmra.mxu2 %v2049_v53  ;;  %v1408_v37 = vld [vmem:[#allocation2 + $0x110] sm:$0xff]  ;;  %v2061_v52 = vor.u32 %v2218_v32, %v2058_v33  ;;  %v1603_v53 = vpack.c.bf16 %v1539_v42, %v1539_v42  ;;  %v1938_v32 = vld [vmem:[%s2522_s19 + $0xc8] sm:$0xf0]  ;;  %v2220_v33 = vld [vmem:[%s2522_s19 + $0x1c4] sm:$0xf] }
  0xd5   : > { %1131 = vmatmul.bf16.gmra.mxu1 %v1925_v58  ;;  %1211 = vmatmul.bf16.gmra.mxu3 %v2053_v59  ;;  %v1246_v36 = vadd.f32 %v1093_v2, %v332_v4  ;;  %1342 = vst.msk [vmem:[#allocation2 + $0x118] sm:$0xff] %vm263_vm0, %v1277_v7  ;;  %v1476_v43 = vadd.f32 %v2687_v5, %v1408_v37  ;;  %v334_v7 = vld [vmem:[#allocation2 + $0x30] sm:$0xff]  ;;  %v367_v37 = vld [vmem:[#allocation2 + $0x138] sm:$0xff] }
  0xd6   : > { %v1377_v44 = vld [vmem:[#allocation2 + $0x18] sm:$0xff]  ;;  %v1572_v59 = vpack.c.bf16 %v1508_v48, %v1508_v48  ;;  %1668 = vst.msk [vmem:[%s2723_s6 + $0x84] sm:$0xf] %vm1634_vm1, %v1603_v53 }
  0xd7   : > { %v1003_v8 = vpop.f32.mrf.mxu2  ;;  %1311 = vst.msk [vmem:[#allocation2 + $0x20] sm:$0xff] %vm263_vm0, %v1246_v36  ;;  %v1445_v49 = vadd.f32 %v2687_v5, %v1377_v44  ;;  %v1540_v54 = vmax.f32 %v1476_v43, 0.0  ;;  %v1941_v44 = vor.u32 %v2188_v31, %v1938_v32 }
  0xd8   : > { %v1172_v10 = vpop.f32.mrf.mxu3  ;;  %1637 = vst.msk [vmem:[%s2723_s6 + $0x8] sm:$0xf] %vm1634_vm1, %v1572_v59 }
  0xd9   : > { %v1173_v11 = vadd.f32 %v1172_v10, %v1003_v8  ;;  %v925_v12 = vpop.f32.mrf.mxu0  ;;  %v1509_v60 = vmax.f32 %v1445_v49, 0.0  ;;  %v1604_v63 = vpack.c.bf16 %v1540_v54, %v1540_v54 }
  0xda   : > { %v1094_v14 = vpop.f32.mrf.mxu1 }
  0xdb   : > { %v1278_v16 = vadd.f32 %v1173_v11, %v364_v9  ;;  %v1095_v17 = vadd.f32 %v1094_v14, %v925_v12  ;;  %v1573_v3 = vpack.c.bf16 %v1509_v60, %v1509_v60  ;;  %1669 = vst.msk [vmem:[%s2723_s6 + $0x88] sm:$0xf] %vm1634_vm1, %v1604_v63 }
  0xdc   : > { %v1409_v50 = vld [vmem:[#allocation2 + $0x118] sm:$0xff] }
  0xdd   : > { %1343 = vst.msk [vmem:[#allocation2 + $0x120] sm:$0xff] %vm263_vm0, %v1278_v16  ;;  %v1247_v26 = vadd.f32 %v1095_v17, %v333_v13  ;;  %v1477_v55 = vadd.f32 %v2687_v5, %v1409_v50 }
  0xde   : > { %v1378_v56 = vld [vmem:[#allocation2 + $0x20] sm:$0xff]  ;;  %1638 = vst.msk [vmem:[%s2723_s6 + $0xc] sm:$0xf] %vm1634_vm1, %v1573_v3 }
  0xdf   : > { %1312 = vst.msk [vmem:[#allocation2 + $0x28] sm:$0xff] %vm263_vm0, %v1247_v26  ;;  %v1005_v38 = vpop.f32.mrf.mxu2  ;;  %v1446_v61 = vadd.f32 %v2687_v5, %v1378_v56  ;;  %v1541_v0 = vmax.f32 %v1477_v55, 0.0  ;;  %v1936_v26 = vld [vmem:[%s2522_s19 + $0xc0] sm:$0xf] }
  0xe0   : > { %v1174_v45 = vpop.f32.mrf.mxu3 }
  0xe1   : > { %v928_v51 = vpop.f32.mrf.mxu0  ;;  %v1175_v57 = vadd.f32 %v1174_v45, %v1005_v38  ;;  %v1510_v4 = vmax.f32 %v1446_v61, 0.0  ;;  %v1605_v36 = vpack.c.bf16 %v1541_v0, %v1541_v0  ;;  %v2069_v45 = vor.u32 %v2220_v33, %v2066_v34  ;;  %v368_v0 = vld [vmem:[#allocation2 + $0x140] sm:$0xff] }
  0xe2   : > { %v1097_v58 = vpop.f32.mrf.mxu1 }
  0xe3   : > { %v1098_v2 = vadd.f32 %v1097_v58, %v928_v51  ;;  %v1279_v9 = vadd.f32 %v1175_v57, %v365_v62  ;;  %v1574_v10 = vpack.c.bf16 %v1510_v4, %v1510_v4  ;;  %1670 = vst.msk [vmem:[%s2723_s6 + $0x8c] sm:$0xf] %vm1634_vm1, %v1605_v36 }
  0xe4   : > { %v1410_v1 = vld [vmem:[#allocation2 + $0x120] sm:$0xff]  ;;  %967 = vmatmul.bf16.gmra.mxu0 %v1929_v39  ;;  %1047 = vmatmul.bf16.gmra.mxu2 %v2057_v40  ;;  %v1937_v39 = vor.u32 %v2189_v27, %v1936_v26  ;;  %v2065_v40 = vor.u32 %v2221_v29, %v2064_v28  ;;  %v369_v26 = vld [vmem:[#allocation2 + $0x148] sm:$0xff] }
  0xe5   : > { %v1478_v6 = vadd.f32 %v2687_v5, %v1410_v1  ;;  %1136 = vmatmul.bf16.gmra.mxu1 %v1933_v46  ;;  %1216 = vmatmul.bf16.gmra.mxu3 %v2061_v52  ;;  %v1248_v14 = vadd.f32 %v1098_v2, %v334_v7  ;;  %1639 = vst.msk [vmem:[%s2723_s6 + $0x10] sm:$0xf] %vm1634_vm1, %v1574_v10  ;;  %v337_v7 = vld [vmem:[#allocation2 + $0x48] sm:$0xff] }
  0xe6   : > { %v1379_v8 = vld [vmem:[#allocation2 + $0x28] sm:$0xff]  ;;  %1344 = vst.msk [vmem:[#allocation2 + $0x128] sm:$0xff] %vm263_vm0, %v1279_v9 }
  0xe7   : > { %v1542_v11 = vmax.f32 %v1478_v6, 0.0  ;;  %v1447_v12 = vadd.f32 %v2687_v5, %v1379_v8  ;;  %v1008_v13 = vpop.f32.mrf.mxu2  ;;  %1313 = vst.msk [vmem:[#allocation2 + $0x30] sm:$0xff] %vm263_vm0, %v1248_v14 }
  0xe8   : > { %v1177_v16 = vpop.f32.mrf.mxu3 }
  0xe9   : > { %v1606_v17 = vpack.c.bf16 %v1542_v11, %v1542_v11  ;;  %v1511_v18 = vmax.f32 %v1447_v12, 0.0  ;;  %v1178_v19 = vadd.f32 %v1177_v16, %v1008_v13  ;;  %v930_v20 = vpop.f32.mrf.mxu0  ;;  %v1944_v11 = vld [vmem:[%s2522_s19 + $0xd0] sm:$0xf]  ;;  %v2191_v12 = vld [vmem:[%s2522_s19 + $0xd4] sm:$0xf0] }
  0xea   : > { %v1099_v22 = vpop.f32.mrf.mxu1  ;;  %v2072_v13 = vld [vmem:[%s2522_s19 + $0x1d0] sm:$0xf]  ;;  %v1945_v28 = vor.u32 %v2191_v12, %v1944_v11  ;;  %v371_v11 = vld [vmem:[#allocation2 + $0x158] sm:$0xff] }
  0xeb   : > { %1671 = vst.msk [vmem:[%s2723_s6 + $0x90] sm:$0xf] %vm1634_vm1, %v1606_v17  ;;  %v1575_v23 = vpack.c.bf16 %v1511_v18, %v1511_v18  ;;  %v1280_v24 = vadd.f32 %v1178_v19, %v366_v15  ;;  %v1100_v25 = vadd.f32 %v1099_v22, %v930_v20  ;;  %v2223_v15 = vld [vmem:[%s2522_s19 + $0x1d4] sm:$0xf0]  ;;  %v2190_v18 = vld [vmem:[%s2522_s19 + $0xd4] sm:$0xf] }
  0xec   : > { %v1946_v19 = vld [vmem:[%s2522_s19 + $0xd8] sm:$0xf0]  ;;  %v2073_v29 = vor.u32 %v2223_v15, %v2072_v13 }
  0xed   : > { %1640 = vst.msk [vmem:[%s2723_s6 + $0x14] sm:$0xf] %vm1634_vm1, %v1575_v23  ;;  %v1249_v30 = vadd.f32 %v1100_v25, %v335_v21  ;;  %v1411_v41 = vld [vmem:[#allocation2 + $0x128] sm:$0xff]  ;;  %v2222_v21 = vld [vmem:[%s2522_s19 + $0x1d4] sm:$0xf] }
  0xee   : > { %1345 = vst.msk [vmem:[#allocation2 + $0x130] sm:$0xff] %vm263_vm0, %v1280_v24  ;;  %v1479_v46 = vadd.f32 %v2687_v5, %v1411_v41  ;;  %v1380_v49 = vld [vmem:[#allocation2 + $0x30] sm:$0xff]  ;;  %v2074_v22 = vld [vmem:[%s2522_s19 + $0x1d8] sm:$0xf0] }
  0xef   : > { %1314 = vst.msk [vmem:[#allocation2 + $0x38] sm:$0xff] %vm263_vm0, %v1249_v30  ;;  %v1010_v35 = vpop.f32.mrf.mxu2  ;;  %v1448_v53 = vadd.f32 %v2687_v5, %v1380_v49  ;;  %v1949_v30 = vor.u32 %v2190_v18, %v1946_v19  ;;  %v370_v49 = vld [vmem:[#allocation2 + $0x150] sm:$0xff] }
  0xf0   : > { %v1179_v38 = vpop.f32.mrf.mxu3  ;;  %v1543_v52 = vmax.f32 %v1479_v46, 0.0 }
  0xf1   : > { %v1180_v42 = vadd.f32 %v1179_v38, %v1010_v35  ;;  %v933_v43 = vpop.f32.mrf.mxu0  ;;  %v1512_v57 = vmax.f32 %v1448_v53, 0.0  ;;  %v2077_v35 = vor.u32 %v2222_v21, %v2074_v22  ;;  %v340_v21 = vld [vmem:[#allocation2 + $0x60] sm:$0xff] }
  0xf2   : > { %v1102_v48 = vpop.f32.mrf.mxu1  ;;  %v1607_v56 = vpack.c.bf16 %v1543_v52, %v1543_v52 }
  0xf3   : > { %v1281_v50 = vadd.f32 %v1180_v42, %v367_v37  ;;  %v1103_v51 = vadd.f32 %v1102_v48, %v933_v43  ;;  %v1576_v62 = vpack.c.bf16 %v1512_v57, %v1512_v57  ;;  %v338_v37 = vld [vmem:[#allocation2 + $0x50] sm:$0xff] }
  0xf4   : > { %972 = vmatmul.bf16.gmra.mxu0 %v1937_v39  ;;  %1052 = vmatmul.bf16.gmra.mxu2 %v2065_v40  ;;  %1672 = vst.msk [vmem:[%s2723_s6 + $0x94] sm:$0xf] %vm1634_vm1, %v1607_v56 }
  0xf5   : > { %v1412_v54 = vld [vmem:[#allocation2 + $0x130] sm:$0xff]  ;;  %1346 = vst.msk [vmem:[#allocation2 + $0x138] sm:$0xff] %vm263_vm0, %v1281_v50  ;;  %v1250_v55 = vadd.f32 %v1103_v51, %v336_v47  ;;  %1141 = vmatmul.bf16.gmra.mxu1 %v1941_v44  ;;  %1221 = vmatmul.bf16.gmra.mxu3 %v2069_v45 }
  0xf6   : > { %v1480_v58 = vadd.f32 %v2687_v5, %v1412_v54  ;;  %v1381_v59 = vld [vmem:[#allocation2 + $0x38] sm:$0xff]  ;;  %1641 = vst.msk [vmem:[%s2723_s6 + $0x18] sm:$0xf] %vm1634_vm1, %v1576_v62  ;;  %v2080_v62 = vld [vmem:[%s2522_s19 + $0x1e0] sm:$0xf] }
  0xf7   : > { %v1449_v60 = vadd.f32 %v2687_v5, %v1381_v59  ;;  %1315 = vst.msk [vmem:[#allocation2 + $0x40] sm:$0xff] %vm263_vm0, %v1250_v55  ;;  %v1013_v61 = vpop.f32.mrf.mxu2  ;;  %v339_v55 = vld [vmem:[#allocation2 + $0x58] sm:$0xff] }
  0xf8   : > { %v1544_v63 = vmax.f32 %v1480_v58, 0.0  ;;  %v1182_v1 = vpop.f32.mrf.mxu3 }
  0xf9   : > { %v1513_v2 = vmax.f32 %v1449_v60, 0.0  ;;  %v1183_v3 = vadd.f32 %v1182_v1, %v1013_v61  ;;  %v935_v4 = vpop.f32.mrf.mxu0  ;;  %v1952_v60 = vld [vmem:[%s2522_s19 + $0xe0] sm:$0xf]  ;;  %v2193_v61 = vld [vmem:[%s2522_s19 + $0xe4] sm:$0xf0] }
  0xfa   : > { %v1608_v6 = vpack.c.bf16 %v1544_v63, %v1544_v63  ;;  %v1104_v36 = vpop.f32.mrf.mxu1  ;;  %v2225_v63 = vld [vmem:[%s2522_s19 + $0x1e4] sm:$0xf0]  ;;  %v1953_v13 = vor.u32 %v2193_v61, %v1952_v60 }
  0xfb   : > { %v1577_v8 = vpack.c.bf16 %v1513_v2, %v1513_v2  ;;  %v1282_v9 = vadd.f32 %v1183_v3, %v368_v0  ;;  %v1105_v10 = vadd.f32 %v1104_v36, %v935_v4  ;;  %v2192_v0 = vld [vmem:[%s2522_s19 + $0xe4] sm:$0xf]  ;;  %v1954_v3 = vld [vmem:[%s2522_s19 + $0xe8] sm:$0xf0] }
  0xfc   : > { %1673 = vst.msk [vmem:[%s2723_s6 + $0x98] sm:$0xf] %vm1634_vm1, %v1608_v6  ;;  %v1413_v14 = vld [vmem:[#allocation2 + $0x138] sm:$0xff]  ;;  %v2082_v36 = vld [vmem:[%s2522_s19 + $0x1e8] sm:$0xf0]  ;;  %v1957_v18 = vor.u32 %v2192_v0, %v1954_v3 }
  0xfd   : > { %1642 = vst.msk [vmem:[%s2723_s6 + $0x1c] sm:$0xf] %vm1634_vm1, %v1577_v8  ;;  %v1481_v16 = vadd.f32 %v2687_v5, %v1413_v14  ;;  %v1251_v17 = vadd.f32 %v1105_v10, %v337_v7  ;;  %v2224_v7 = vld [vmem:[%s2522_s19 + $0x1e4] sm:$0xf]  ;;  %v2081_v14 = vor.u32 %v2225_v63, %v2080_v62  ;;  %v373_v60 = vld [vmem:[#allocation2 + $0x168] sm:$0xff] }
  0xfe   : > { %v1382_v20 = vld [vmem:[#allocation2 + $0x40] sm:$0xff]  ;;  %1347 = vst.msk [vmem:[#allocation2 + $0x140] sm:$0xff] %vm263_vm0, %v1282_v9  ;;  %v2085_v19 = vor.u32 %v2224_v7, %v2082_v36  ;;  %v342_v7 = vld [vmem:[#allocation2 + $0x70] sm:$0xff] }
  0xff   : > { %v1545_v23 = vmax.f32 %v1481_v16, 0.0  ;;  %v1450_v24 = vadd.f32 %v2687_v5, %v1382_v20  ;;  %1316 = vst.msk [vmem:[#allocation2 + $0x48] sm:$0xff] %vm263_vm0, %v1251_v17  ;;  %v1015_v25 = vpop.f32.mrf.mxu2 }
 0x100   : > { %v1184_v27 = vpop.f32.mrf.mxu3 }
 0x101   : > { %v1609_v31 = vpack.c.bf16 %v1545_v23, %v1545_v23  ;;  %v1514_v32 = vmax.f32 %v1450_v24, 0.0  ;;  %v1185_v33 = vadd.f32 %v1184_v27, %v1015_v25  ;;  %v938_v34 = vpop.f32.mrf.mxu0 }
 0x102   : > { %v1107_v38 = vpop.f32.mrf.mxu1 }
 0x103   : > { %1674 = vst.msk [vmem:[%s2723_s6 + $0x9c] sm:$0xf] %vm1634_vm1, %v1609_v31  ;;  %v1578_v39 = vpack.c.bf16 %v1514_v32, %v1514_v32  ;;  %v1283_v40 = vadd.f32 %v1185_v33, %v369_v26  ;;  %v1108_v41 = vadd.f32 %v1107_v38, %v938_v34  ;;  %v372_v33 = vld [vmem:[#allocation2 + $0x160] sm:$0xff] }
 0x104   : > { %977 = vmatmul.bf16.gmra.mxu0 %v1945_v28  ;;  %1057 = vmatmul.bf16.gmra.mxu2 %v2073_v29 }
 0x105   : > { %1643 = vst.msk [vmem:[%s2723_s6 + $0x20] sm:$0xf] %vm1634_vm1, %v1578_v39  ;;  %v1414_v42 = vld [vmem:[#allocation2 + $0x140] sm:$0xff]  ;;  %v1252_v43 = vadd.f32 %v1108_v41, %v338_v37  ;;  %1146 = vmatmul.bf16.gmra.mxu1 %v1949_v30  ;;  %1226 = vmatmul.bf16.gmra.mxu3 %v2077_v35 }
 0x106   : > { %v1482_v44 = vadd.f32 %v2687_v5, %v1414_v42  ;;  %v1383_v45 = vld [vmem:[#allocation2 + $0x48] sm:$0xff]  ;;  %1348 = vst.msk [vmem:[#allocation2 + $0x148] sm:$0xff] %vm263_vm0, %v1283_v40 }
 0x107   : > { %v1451_v46 = vadd.f32 %v2687_v5, %v1383_v45  ;;  %1317 = vst.msk [vmem:[#allocation2 + $0x50] sm:$0xff] %vm263_vm0, %v1252_v43  ;;  %v1018_v47 = vpop.f32.mrf.mxu2  ;;  %v341_v40 = vld [vmem:[#allocation2 + $0x68] sm:$0xff]  ;;  %v1960_v45 = vld [vmem:[%s2522_s19 + $0xf0] sm:$0xf] }
 0x108   : > { %v1546_v48 = vmax.f32 %v1482_v44, 0.0  ;;  %v1187_v50 = vpop.f32.mrf.mxu3 }
 0x109   : > { %v1515_v51 = vmax.f32 %v1451_v46, 0.0  ;;  %v1188_v52 = vadd.f32 %v1187_v50, %v1018_v47  ;;  %v940_v53 = vpop.f32.mrf.mxu0  ;;  %v2195_v46 = vld [vmem:[%s2522_s19 + $0xf4] sm:$0xf0]  ;;  %v2088_v47 = vld [vmem:[%s2522_s19 + $0x1f0] sm:$0xf] }
 0x10a   : > { %v1610_v54 = vpack.c.bf16 %v1546_v48, %v1546_v48  ;;  %v1109_v56 = vpop.f32.mrf.mxu1  ;;  %v2227_v48 = vld [vmem:[%s2522_s19 + $0x1f4] sm:$0xf0]  ;;  %v1961_v62 = vor.u32 %v2195_v46, %v1960_v45 }
 0x10b   : > { %v1579_v57 = vpack.c.bf16 %v1515_v51, %v1515_v51  ;;  %v1284_v58 = vadd.f32 %v1188_v52, %v370_v49  ;;  %v1110_v59 = vadd.f32 %v1109_v56, %v940_v53  ;;  %v2194_v49 = vld [vmem:[%s2522_s19 + $0xf4] sm:$0xf]  ;;  %v1962_v52 = vld [vmem:[%s2522_s19 + $0xf8] sm:$0xf0]  ;;  %v2089_v63 = vor.u32 %v2227_v48, %v2088_v47 }
 0x10c   : > { %1675 = vst.msk [vmem:[%s2723_s6 + $0xa0] sm:$0xf] %vm1634_vm1, %v1610_v54  ;;  %v2090_v56 = vld [vmem:[%s2522_s19 + $0x1f8] sm:$0xf0]  ;;  %v1965_v3 = vor.u32 %v2194_v49, %v1962_v52 }
 0x10d   : > { %1644 = vst.msk [vmem:[%s2723_s6 + $0x24] sm:$0xf] %vm1634_vm1, %v1579_v57  ;;  %v1415_v1 = vld [vmem:[#allocation2 + $0x148] sm:$0xff]  ;;  %v1253_v2 = vadd.f32 %v1110_v59, %v339_v55  ;;  %v2226_v55 = vld [vmem:[%s2522_s19 + $0x1f4] sm:$0xf]  ;;  %s1712_s19 = scalar_lea.hbm %s3102_s3, %s2244_s9 }
 0x10e   : > { %v1483_v4 = vadd.f32 %v2687_v5, %v1415_v1  ;;  %v1384_v6 = vld [vmem:[#allocation2 + $0x50] sm:$0xff]  ;;  %1349 = vst.msk [vmem:[#allocation2 + $0x150] sm:$0xff] %vm263_vm0, %v1284_v58  ;;  %s1715_s21 = sshll.u32 %s1712_s19, 4  ;;  %s1716_s21 = int_to_ptr.hbm [resolvable:$true] %s1715_s21 }
 0x10f   : > { %v1452_v8 = vadd.f32 %v2687_v5, %v1384_v6  ;;  %1318 = vst.msk [vmem:[#allocation2 + $0x58] sm:$0xff] %vm263_vm0, %v1253_v2  ;;  %v1020_v9 = vpop.f32.mrf.mxu2  ;;  %s2335_s23 = sshra.s32 %s1716_s21, 4  ;;  %s2336_s23 = int_to_ptr.hbm [resolvable:$true] %s2335_s23 }
 0x110   : > { %v1547_v10 = vmax.f32 %v1483_v4, 0.0  ;;  %v1189_v12 = vpop.f32.mrf.mxu3  ;;  %v2093_v4 = vor.u32 %v2226_v55, %v2090_v56  ;;  %v376_v55 = vld [vmem:[#allocation2 + $0x180] sm:$0xff]  ;;  %s2337_s26 = scalar_lea.hbm %s2336_s23, 256  ;;  %p2342_p1 = scmp.lt.s32.totalorder %s2336_s23, %s3102_s3 }
 0x111   : > { %v1516_v15 = vmax.f32 %v1452_v8, 0.0  ;;  %v1190_v16 = vadd.f32 %v1189_v12, %v1020_v9  ;;  %v943_v17 = vpop.f32.mrf.mxu0  ;;  %p2338_p12 = scmp.ne.s32.totalorder %s2336_s23, %s2337_s26  ;;  %p2343_p2 = scmp.lt.s32.totalorder %s2341_s29, %s2337_s26 }
 0x112   : > { %v1611_v20 = vpack.c.bf16 %v1547_v10, %v1547_v10  ;;  %v1112_v22 = vpop.f32.mrf.mxu1 }
 0x113   : > { %v1580_v23 = vpack.c.bf16 %v1516_v15, %v1516_v15  ;;  %v1285_v24 = vadd.f32 %v1190_v16, %v371_v11  ;;  %v1113_v25 = vadd.f32 %v1112_v22, %v943_v17  ;;  %p2339_p13 = pnand %p2338_p12, %p2464_p4  ;;  %p2344_p3 = por %p2343_p2, %p2342_p1 }
 0x114   : > { %1676 = vst.msk [vmem:[%s2723_s6 + $0xa4] sm:$0xf] %vm1634_vm1, %v1611_v20  ;;  %982 = vmatmul.bf16.gmra.mxu0 %v1953_v13  ;;  %1062 = vmatmul.bf16.gmra.mxu2 %v2081_v14 }
 0x115   : > { %1645 = vst.msk [vmem:[%s2723_s6 + $0x28] sm:$0xf] %vm1634_vm1, %v1580_v23  ;;  %v1416_v26 = vld [vmem:[#allocation2 + $0x150] sm:$0xff]  ;;  %v1254_v27 = vadd.f32 %v1113_v25, %v340_v21  ;;  %1151 = vmatmul.bf16.gmra.mxu1 %v1957_v18  ;;  %1231 = vmatmul.bf16.gmra.mxu3 %v2085_v19  ;;  %p2340_p0 = pneg %p2339_p13 }
 0x116   : > { %v1484_v28 = vadd.f32 %v2687_v5, %v1416_v26  ;;  %v1385_v29 = vld [vmem:[#allocation2 + $0x58] sm:$0xff]  ;;  %1350 = vst.msk [vmem:[#allocation2 + $0x158] sm:$0xff] %vm263_vm0, %v1285_v24  ;;  %v374_v18 = vld [vmem:[#allocation2 + $0x170] sm:$0xff] }
 0x117   : > { %v1453_v30 = vadd.f32 %v2687_v5, %v1385_v29  ;;  %1319 = vst.msk [vmem:[#allocation2 + $0x60] sm:$0xff] %vm263_vm0, %v1254_v27  ;;  %v1023_v31 = vpop.f32.mrf.mxu2  ;;  %v343_v24 = vld [vmem:[#allocation2 + $0x78] sm:$0xff]  ;;  %p2345_p5 = pnand %p2344_p3, %p2340_p0 }
 0x118   : > { %v1548_v32 = vmax.f32 %v1484_v28, 0.0  ;;  %v1192_v34 = vpop.f32.mrf.mxu3 }
 0x119   : > { %v1517_v35 = vmax.f32 %v1453_v30, 0.0  ;;  %v1193_v37 = vadd.f32 %v1192_v34, %v1023_v31  ;;  %v945_v38 = vpop.f32.mrf.mxu0 }
 0x11a   : > { %v1612_v39 = vpack.c.bf16 %v1548_v32, %v1548_v32  ;;  %v1114_v41 = vpop.f32.mrf.mxu1 }
 0x11b   : > { %v1581_v42 = vpack.c.bf16 %v1517_v35, %v1517_v35  ;;  %v1286_v43 = vadd.f32 %v1193_v37, %v372_v33  ;;  %v1115_v44 = vadd.f32 %v1114_v41, %v945_v38  ;;  %v375_v37 = vld [vmem:[#allocation2 + $0x178] sm:$0xff] }
 0x11c   : > { %1677 = vst.msk [vmem:[%s2723_s6 + $0xa8] sm:$0xf] %vm1634_vm1, %v1612_v39 }
 0x11d   : > { %1646 = vst.msk [vmem:[%s2723_s6 + $0x2c] sm:$0xf] %vm1634_vm1, %v1581_v42  ;;  %v1417_v50 = vld [vmem:[#allocation2 + $0x158] sm:$0xff]  ;;  %v1255_v51 = vadd.f32 %v1115_v44, %v341_v40 }
 0x11e   : > { %v1485_v53 = vadd.f32 %v2687_v5, %v1417_v50  ;;  %v1386_v54 = vld [vmem:[#allocation2 + $0x60] sm:$0xff]  ;;  %1351 = vst.msk [vmem:[#allocation2 + $0x160] sm:$0xff] %vm263_vm0, %v1286_v43 }
 0x11f   : > { %v1454_v57 = vadd.f32 %v2687_v5, %v1386_v54  ;;  %1320 = vst.msk [vmem:[#allocation2 + $0x68] sm:$0xff] %vm263_vm0, %v1255_v51  ;;  %v1025_v58 = vpop.f32.mrf.mxu2  ;;  %v344_v43 = vld [vmem:[#allocation2 + $0x80] sm:$0xff] }
 0x120   : > { %v1549_v59 = vmax.f32 %v1485_v53, 0.0  ;;  %v1194_v61 = vpop.f32.mrf.mxu3 }
 0x121   : > { %v1518_v0 = vmax.f32 %v1454_v57, 0.0  ;;  %v1195_v1 = vadd.f32 %v1194_v61, %v1025_v58  ;;  %v948_v2 = vpop.f32.mrf.mxu0  ;;  %v345_v61 = vld [vmem:[#allocation2 + $0x88] sm:$0xff] }
 0x122   : > { %v1613_v6 = vpack.c.bf16 %v1549_v59, %v1549_v59  ;;  %v1117_v36 = vpop.f32.mrf.mxu1 }
 0x123   : > { %v1582_v8 = vpack.c.bf16 %v1518_v0, %v1518_v0  ;;  %v1287_v9 = vadd.f32 %v1195_v1, %v373_v60  ;;  %v1118_v10 = vadd.f32 %v1117_v36, %v948_v2 }
 0x124   : > { %1678 = vst.msk [vmem:[%s2723_s6 + $0xac] sm:$0xf] %vm1634_vm1, %v1613_v6  ;;  %987 = vmatmul.bf16.gmra.mxu0 %v1961_v62  ;;  %1067 = vmatmul.bf16.gmra.mxu2 %v2089_v63 }
 0x125   : > { %1647 = vst.msk [vmem:[%s2723_s6 + $0x30] sm:$0xf] %vm1634_vm1, %v1582_v8  ;;  %v1418_v11 = vld [vmem:[#allocation2 + $0x160] sm:$0xff]  ;;  %v1256_v12 = vadd.f32 %v1118_v10, %v342_v7  ;;  %1156 = vmatmul.bf16.gmra.mxu1 %v1965_v3  ;;  %1236 = vmatmul.bf16.gmra.mxu3 %v2093_v4 }
 0x126   : > { %v1486_v13 = vadd.f32 %v2687_v5, %v1418_v11  ;;  %v1387_v14 = vld [vmem:[#allocation2 + $0x68] sm:$0xff]  ;;  %1352 = vst.msk [vmem:[#allocation2 + $0x168] sm:$0xff] %vm263_vm0, %v1287_v9 }
 0x127   : > { %v1455_v15 = vadd.f32 %v2687_v5, %v1387_v14  ;;  %1321 = vst.msk [vmem:[#allocation2 + $0x70] sm:$0xff] %vm263_vm0, %v1256_v12  ;;  %v1028_v16 = vpop.f32.mrf.mxu2  ;;  %v377_v9 = vld [vmem:[#allocation2 + $0x188] sm:$0xff] }
 0x128   : > { %v1550_v17 = vmax.f32 %v1486_v13, 0.0  ;;  %v1197_v19 = vpop.f32.mrf.mxu3 }
 0x129   : > { %v1519_v20 = vmax.f32 %v1455_v15, 0.0  ;;  %v1198_v21 = vadd.f32 %v1197_v19, %v1028_v16  ;;  %v950_v22 = vpop.f32.mrf.mxu0  ;;  %v346_v15 = vld [vmem:[#allocation2 + $0x90] sm:$0xff] }
 0x12a   : > { %v1614_v23 = vpack.c.bf16 %v1550_v17, %v1550_v17  ;;  %v1119_v25 = vpop.f32.mrf.mxu1 }
 0x12b   : > { %v1583_v26 = vpack.c.bf16 %v1519_v20, %v1519_v20  ;;  %v1288_v27 = vadd.f32 %v1198_v21, %v374_v18  ;;  %v1120_v28 = vadd.f32 %v1119_v25, %v950_v22  ;;  %v2936_v21 = vld [vmem:[%s3101_s2] ss:$0 sm:$0xff] }
 0x12c   : > { %1679 = vst.msk [vmem:[%s2723_s6 + $0xb0] sm:$0xf] %vm1634_vm1, %v1614_v23 }
 0x12d   : > { %1648 = vst.msk [vmem:[%s2723_s6 + $0x34] sm:$0xf] %vm1634_vm1, %v1583_v26  ;;  %v1419_v29 = vld [vmem:[#allocation2 + $0x168] sm:$0xff]  ;;  %v1257_v30 = vadd.f32 %v1120_v28, %v343_v24 }
 0x12e   : > { %v1487_v31 = vadd.f32 %v2687_v5, %v1419_v29  ;;  %v1388_v32 = vld [vmem:[#allocation2 + $0x70] sm:$0xff]  ;;  %1353 = vst.msk [vmem:[#allocation2 + $0x170] sm:$0xff] %vm263_vm0, %v1288_v27 }
 0x12f   : > { %v1456_v33 = vadd.f32 %v2687_v5, %v1388_v32  ;;  %1322 = vst.msk [vmem:[#allocation2 + $0x78] sm:$0xff] %vm263_vm0, %v1257_v30  ;;  %v1030_v34 = vpop.f32.mrf.mxu2  ;;  %v378_v27 = vld [vmem:[#allocation2 + $0x190] sm:$0xff] }
 0x130   : > { %v1551_v35 = vmax.f32 %v1487_v31, 0.0  ;;  %v1199_v38 = vpop.f32.mrf.mxu3 }
 0x131   : > { %v1520_v39 = vmax.f32 %v1456_v33, 0.0  ;;  %v1200_v40 = vadd.f32 %v1199_v38, %v1030_v34  ;;  %v953_v41 = vpop.f32.mrf.mxu0  ;;  %v347_v33 = vld [vmem:[#allocation2 + $0x98] sm:$0xff] }
 0x132   : > { %v1615_v42 = vpack.c.bf16 %v1551_v35, %v1551_v35  ;;  %v1122_v44 = vpop.f32.mrf.mxu1 }
 0x133   : > { %v1584_v45 = vpack.c.bf16 %v1520_v39, %v1520_v39  ;;  %v1289_v46 = vadd.f32 %v1200_v40, %v375_v37  ;;  %v1123_v47 = vadd.f32 %v1122_v44, %v953_v41 }
 0x134   : > { %1680 = vst.msk [vmem:[%s2723_s6 + $0xb4] sm:$0xf] %vm1634_vm1, %v1615_v42 }
 0x135   : > { %1649 = vst.msk [vmem:[%s2723_s6 + $0x38] sm:$0xf] %vm1634_vm1, %v1584_v45  ;;  %v1420_v48 = vld [vmem:[#allocation2 + $0x170] sm:$0xff]  ;;  %v1258_v49 = vadd.f32 %v1123_v47, %v344_v43 }
 0x136   : > { %v1488_v50 = vadd.f32 %v2687_v5, %v1420_v48  ;;  %v1389_v51 = vld [vmem:[#allocation2 + $0x78] sm:$0xff]  ;;  %1354 = vst.msk [vmem:[#allocation2 + $0x178] sm:$0xff] %vm263_vm0, %v1289_v46 }
 0x137   : > { %v1457_v52 = vadd.f32 %v2687_v5, %v1389_v51  ;;  %1323 = vst.msk [vmem:[#allocation2 + $0x80] sm:$0xff] %vm263_vm0, %v1258_v49  ;;  %v1033_v53 = vpop.f32.mrf.mxu2  ;;  %v379_v46 = vld [vmem:[#allocation2 + $0x198] sm:$0xff] }
 0x138   : > { %v1552_v54 = vmax.f32 %v1488_v50, 0.0  ;;  %v1202_v56 = vpop.f32.mrf.mxu3 }
 0x139   : > { %v1521_v57 = vmax.f32 %v1457_v52, 0.0  ;;  %v1203_v58 = vadd.f32 %v1202_v56, %v1033_v53  ;;  %v955_v59 = vpop.f32.mrf.mxu0  ;;  %v348_v52 = vld [vmem:[#allocation2 + $0xa0] sm:$0xff] }
 0x13a   : > { %v1616_v60 = vpack.c.bf16 %v1552_v54, %v1552_v54  ;;  %v1124_v62 = vpop.f32.mrf.mxu1 }
 0x13b   : > { %v1585_v63 = vpack.c.bf16 %v1521_v57, %v1521_v57  ;;  %v1290_v0 = vadd.f32 %v1203_v58, %v376_v55  ;;  %v1125_v1 = vadd.f32 %v1124_v62, %v955_v59 }
 0x13c   : > { %1681 = vst.msk [vmem:[%s2723_s6 + $0xb8] sm:$0xf] %vm1634_vm1, %v1616_v60 }
 0x13d   : > { %1650 = vst.msk [vmem:[%s2723_s6 + $0x3c] sm:$0xf] %vm1634_vm1, %v1585_v63  ;;  %v1421_v2 = vld [vmem:[#allocation2 + $0x178] sm:$0xff]  ;;  %v1259_v3 = vadd.f32 %v1125_v1, %v345_v61 }
 0x13e   : > { %v1489_v4 = vadd.f32 %v2687_v5, %v1421_v2  ;;  %v1390_v6 = vld [vmem:[#allocation2 + $0x80] sm:$0xff]  ;;  %1355 = vst.msk [vmem:[#allocation2 + $0x180] sm:$0xff] %vm263_vm0, %v1290_v0 }
 0x13f   : > { %v1458_v7 = vadd.f32 %v2687_v5, %v1390_v6  ;;  %1324 = vst.msk [vmem:[#allocation2 + $0x88] sm:$0xff] %vm263_vm0, %v1259_v3  ;;  %v1035_v36 = vpop.f32.mrf.mxu2  ;;  %v380_v0 = vld [vmem:[#allocation2 + $0x1a0] sm:$0xff] }
 0x140   : > { %v1553_v8 = vmax.f32 %v1489_v4, 0.0  ;;  %v1204_v10 = vpop.f32.mrf.mxu3 }
 0x141   : > { %v1522_v11 = vmax.f32 %v1458_v7, 0.0  ;;  %v1205_v12 = vadd.f32 %v1204_v10, %v1035_v36  ;;  %v958_v13 = vpop.f32.mrf.mxu0  ;;  %v349_v7 = vld [vmem:[#allocation2 + $0xa8] sm:$0xff] }
 0x142   : > { %v1617_v14 = vpack.c.bf16 %v1553_v8, %v1553_v8  ;;  %v1127_v16 = vpop.f32.mrf.mxu1 }
 0x143   : > { %v1586_v17 = vpack.c.bf16 %v1522_v11, %v1522_v11  ;;  %v1291_v18 = vadd.f32 %v1205_v12, %v377_v9  ;;  %v1128_v19 = vadd.f32 %v1127_v16, %v958_v13 }
 0x144   : > { %1682 = vst.msk [vmem:[%s2723_s6 + $0xbc] sm:$0xf] %vm1634_vm1, %v1617_v14 }
 0x145   : > { %1651 = vst.msk [vmem:[%s2723_s6 + $0x40] sm:$0xf] %vm1634_vm1, %v1586_v17  ;;  %v1422_v5 = vld [vmem:[#allocation2 + $0x180] sm:$0xff]  ;;  %v1260_v20 = vadd.f32 %v1128_v19, %v346_v15 }
 0x146   : > { %v1490_v22 = vadd.f32 %v2936_v21, %v1422_v5  ;;  %v1391_v23 = vld [vmem:[#allocation2 + $0x88] sm:$0xff]  ;;  %1356 = vst.msk [vmem:[#allocation2 + $0x188] sm:$0xff] %vm263_vm0, %v1291_v18 }
 0x147   : > { %v1459_v24 = vadd.f32 %v2936_v21, %v1391_v23  ;;  %1325 = vst.msk [vmem:[#allocation2 + $0x90] sm:$0xff] %vm263_vm0, %v1260_v20  ;;  %v1038_v25 = vpop.f32.mrf.mxu2  ;;  %v381_v18 = vld [vmem:[#allocation2 + $0x1a8] sm:$0xff] }
 0x148   : > { %v1554_v26 = vmax.f32 %v1490_v22, 0.0  ;;  %v1207_v28 = vpop.f32.mrf.mxu3 }
 0x149   : > { %v1523_v29 = vmax.f32 %v1459_v24, 0.0  ;;  %v1208_v30 = vadd.f32 %v1207_v28, %v1038_v25  ;;  %v960_v31 = vpop.f32.mrf.mxu0  ;;  %v350_v24 = vld [vmem:[#allocation2 + $0xb0] sm:$0xff] }
 0x14a   : > { %v1618_v32 = vpack.c.bf16 %v1554_v26, %v1554_v26  ;;  %v1129_v34 = vpop.f32.mrf.mxu1 }
 0x14b   : > { %v1587_v35 = vpack.c.bf16 %v1523_v29, %v1523_v29  ;;  %v1292_v37 = vadd.f32 %v1208_v30, %v378_v27  ;;  %v1130_v38 = vadd.f32 %v1129_v34, %v960_v31 }
 0x14c   : > { %1683 = vst.msk [vmem:[%s2723_s6 + $0xc0] sm:$0xf] %vm1634_vm1, %v1618_v32 }
 0x14d   : > { %1652 = vst.msk [vmem:[%s2723_s6 + $0x44] sm:$0xf] %vm1634_vm1, %v1587_v35  ;;  %v1423_v39 = vld [vmem:[#allocation2 + $0x188] sm:$0xff]  ;;  %v1261_v40 = vadd.f32 %v1130_v38, %v347_v33 }
 0x14e   : > { %v1491_v41 = vadd.f32 %v2936_v21, %v1423_v39  ;;  %v1392_v42 = vld [vmem:[#allocation2 + $0x90] sm:$0xff]  ;;  %1357 = vst.msk [vmem:[#allocation2 + $0x190] sm:$0xff] %vm263_vm0, %v1292_v37 }
 0x14f   : > { %v1460_v43 = vadd.f32 %v2936_v21, %v1392_v42  ;;  %1326 = vst.msk [vmem:[#allocation2 + $0x98] sm:$0xff] %vm263_vm0, %v1261_v40  ;;  %v1040_v44 = vpop.f32.mrf.mxu2  ;;  %v382_v37 = vld [vmem:[#allocation2 + $0x1b0] sm:$0xff] }
 0x150   : > { %v1555_v45 = vmax.f32 %v1491_v41, 0.0  ;;  %v1209_v47 = vpop.f32.mrf.mxu3 }
 0x151   : > { %v1524_v48 = vmax.f32 %v1460_v43, 0.0  ;;  %v1210_v49 = vadd.f32 %v1209_v47, %v1040_v44  ;;  %v963_v50 = vpop.f32.mrf.mxu0  ;;  %v351_v43 = vld [vmem:[#allocation2 + $0xb8] sm:$0xff] }
 0x152   : > { %v1619_v51 = vpack.c.bf16 %v1555_v45, %v1555_v45  ;;  %v1132_v53 = vpop.f32.mrf.mxu1 }
 0x153   : > { %v1588_v54 = vpack.c.bf16 %v1524_v48, %v1524_v48  ;;  %v1293_v55 = vadd.f32 %v1210_v49, %v379_v46  ;;  %v1133_v56 = vadd.f32 %v1132_v53, %v963_v50 }
 0x154   : > { %1684 = vst.msk [vmem:[%s2723_s6 + $0xc4] sm:$0xf] %vm1634_vm1, %v1619_v51 }
 0x155   : > { %1653 = vst.msk [vmem:[%s2723_s6 + $0x48] sm:$0xf] %vm1634_vm1, %v1588_v54  ;;  %v1424_v57 = vld [vmem:[#allocation2 + $0x190] sm:$0xff]  ;;  %v1262_v58 = vadd.f32 %v1133_v56, %v348_v52 }
 0x156   : > { %v1492_v59 = vadd.f32 %v2936_v21, %v1424_v57  ;;  %v1393_v60 = vld [vmem:[#allocation2 + $0x98] sm:$0xff]  ;;  %1358 = vst.msk [vmem:[#allocation2 + $0x198] sm:$0xff] %vm263_vm0, %v1293_v55 }
 0x157   : > { %v1461_v61 = vadd.f32 %v2936_v21, %v1393_v60  ;;  %1327 = vst.msk [vmem:[#allocation2 + $0xa0] sm:$0xff] %vm263_vm0, %v1262_v58  ;;  %v1043_v62 = vpop.f32.mrf.mxu2  ;;  %v383_v55 = vld [vmem:[#allocation2 + $0x1b8] sm:$0xff] }
 0x158   : > { %v1556_v63 = vmax.f32 %v1492_v59, 0.0  ;;  %v1212_v1 = vpop.f32.mrf.mxu3 }
 0x159   : > { %v1525_v2 = vmax.f32 %v1461_v61, 0.0  ;;  %v1213_v3 = vadd.f32 %v1212_v1, %v1043_v62  ;;  %v965_v4 = vpop.f32.mrf.mxu0  ;;  %v352_v61 = vld [vmem:[#allocation2 + $0xc0] sm:$0xff] }
 0x15a   : > { %v1620_v6 = vpack.c.bf16 %v1556_v63, %v1556_v63  ;;  %v1134_v36 = vpop.f32.mrf.mxu1 }
 0x15b   : > { %v1589_v8 = vpack.c.bf16 %v1525_v2, %v1525_v2  ;;  %v1294_v9 = vadd.f32 %v1213_v3, %v380_v0  ;;  %v1135_v10 = vadd.f32 %v1134_v36, %v965_v4 }
 0x15c   : > { %1685 = vst.msk [vmem:[%s2723_s6 + $0xc8] sm:$0xf] %vm1634_vm1, %v1620_v6 }
 0x15d   : > { %1654 = vst.msk [vmem:[%s2723_s6 + $0x4c] sm:$0xf] %vm1634_vm1, %v1589_v8  ;;  %v1425_v11 = vld [vmem:[#allocation2 + $0x198] sm:$0xff]  ;;  %v1263_v12 = vadd.f32 %v1135_v10, %v349_v7 }
 0x15e   : > { %v1493_v13 = vadd.f32 %v2936_v21, %v1425_v11  ;;  %v1394_v14 = vld [vmem:[#allocation2 + $0xa0] sm:$0xff]  ;;  %1359 = vst.msk [vmem:[#allocation2 + $0x1a0] sm:$0xff] %vm263_vm0, %v1294_v9 }
 0x15f   : > { %v1462_v15 = vadd.f32 %v2936_v21, %v1394_v14  ;;  %1328 = vst.msk [vmem:[#allocation2 + $0xa8] sm:$0xff] %vm263_vm0, %v1263_v12  ;;  %v1045_v16 = vpop.f32.mrf.mxu2  ;;  %v384_v9 = vld [vmem:[#allocation2 + $0x1c0] sm:$0xff] }
 0x160   : > { %v1557_v17 = vmax.f32 %v1493_v13, 0.0  ;;  %v1214_v19 = vpop.f32.mrf.mxu3 }
 0x161   : > { %v1526_v5 = vmax.f32 %v1462_v15, 0.0  ;;  %v1215_v20 = vadd.f32 %v1214_v19, %v1045_v16  ;;  %v968_v22 = vpop.f32.mrf.mxu0  ;;  %v353_v15 = vld [vmem:[#allocation2 + $0xc8] sm:$0xff] }
 0x162   : > { %v1621_v23 = vpack.c.bf16 %v1557_v17, %v1557_v17  ;;  %v1137_v25 = vpop.f32.mrf.mxu1 }
 0x163   : > { %v1590_v26 = vpack.c.bf16 %v1526_v5, %v1526_v5  ;;  %v1295_v27 = vadd.f32 %v1215_v20, %v381_v18  ;;  %v1138_v28 = vadd.f32 %v1137_v25, %v968_v22 }
 0x164   : > { %1686 = vst.msk [vmem:[%s2723_s6 + $0xcc] sm:$0xf] %vm1634_vm1, %v1621_v23 }
 0x165   : > { %1655 = vst.msk [vmem:[%s2723_s6 + $0x50] sm:$0xf] %vm1634_vm1, %v1590_v26  ;;  %v1426_v29 = vld [vmem:[#allocation2 + $0x1a0] sm:$0xff]  ;;  %v1264_v30 = vadd.f32 %v1138_v28, %v350_v24 }
 0x166   : > { %v1494_v31 = vadd.f32 %v2936_v21, %v1426_v29  ;;  %v1395_v32 = vld [vmem:[#allocation2 + $0xa8] sm:$0xff]  ;;  %1360 = vst.msk [vmem:[#allocation2 + $0x1a8] sm:$0xff] %vm263_vm0, %v1295_v27 }
 0x167   : > { %v1463_v33 = vadd.f32 %v2936_v21, %v1395_v32  ;;  %1329 = vst.msk [vmem:[#allocation2 + $0xb0] sm:$0xff] %vm263_vm0, %v1264_v30  ;;  %v1048_v34 = vpop.f32.mrf.mxu2  ;;  %v385_v27 = vld [vmem:[#allocation2 + $0x1c8] sm:$0xff] }
 0x168   : > { %v1558_v35 = vmax.f32 %v1494_v31, 0.0  ;;  %v1217_v38 = vpop.f32.mrf.mxu3 }
 0x169   : > { %v1527_v39 = vmax.f32 %v1463_v33, 0.0  ;;  %v1218_v40 = vadd.f32 %v1217_v38, %v1048_v34  ;;  %v970_v41 = vpop.f32.mrf.mxu0  ;;  %v354_v33 = vld [vmem:[#allocation2 + $0xd0] sm:$0xff] }
 0x16a   : > { %v1622_v42 = vpack.c.bf16 %v1558_v35, %v1558_v35  ;;  %v1139_v44 = vpop.f32.mrf.mxu1 }
 0x16b   : > { %v1591_v45 = vpack.c.bf16 %v1527_v39, %v1527_v39  ;;  %v1296_v46 = vadd.f32 %v1218_v40, %v382_v37  ;;  %v1140_v47 = vadd.f32 %v1139_v44, %v970_v41 }
 0x16c   : > { %1687 = vst.msk [vmem:[%s2723_s6 + $0xd0] sm:$0xf] %vm1634_vm1, %v1622_v42 }
 0x16d   : > { %1656 = vst.msk [vmem:[%s2723_s6 + $0x54] sm:$0xf] %vm1634_vm1, %v1591_v45  ;;  %v1427_v48 = vld [vmem:[#allocation2 + $0x1a8] sm:$0xff]  ;;  %v1265_v49 = vadd.f32 %v1140_v47, %v351_v43 }
 0x16e   : > { %v1495_v50 = vadd.f32 %v2936_v21, %v1427_v48  ;;  %v1396_v51 = vld [vmem:[#allocation2 + $0xb0] sm:$0xff]  ;;  %1361 = vst.msk [vmem:[#allocation2 + $0x1b0] sm:$0xff] %vm263_vm0, %v1296_v46 }
 0x16f   : > { %v1464_v52 = vadd.f32 %v2936_v21, %v1396_v51  ;;  %1330 = vst.msk [vmem:[#allocation2 + $0xb8] sm:$0xff] %vm263_vm0, %v1265_v49  ;;  %v1050_v53 = vpop.f32.mrf.mxu2  ;;  %v386_v46 = vld [vmem:[#allocation2 + $0x1d0] sm:$0xff] }
 0x170   : > { %v1559_v54 = vmax.f32 %v1495_v50, 0.0  ;;  %v1219_v56 = vpop.f32.mrf.mxu3 }
 0x171   : > { %v1528_v57 = vmax.f32 %v1464_v52, 0.0  ;;  %v1220_v58 = vadd.f32 %v1219_v56, %v1050_v53  ;;  %v973_v59 = vpop.f32.mrf.mxu0  ;;  %v355_v52 = vld [vmem:[#allocation2 + $0xd8] sm:$0xff] }
 0x172   : > { %v1623_v60 = vpack.c.bf16 %v1559_v54, %v1559_v54  ;;  %v1142_v62 = vpop.f32.mrf.mxu1 }
 0x173   : > { %v1592_v63 = vpack.c.bf16 %v1528_v57, %v1528_v57  ;;  %v1297_v0 = vadd.f32 %v1220_v58, %v383_v55  ;;  %v1143_v1 = vadd.f32 %v1142_v62, %v973_v59 }
 0x174   : > { %1688 = vst.msk [vmem:[%s2723_s6 + $0xd4] sm:$0xf] %vm1634_vm1, %v1623_v60 }
 0x175   : > { %1657 = vst.msk [vmem:[%s2723_s6 + $0x58] sm:$0xf] %vm1634_vm1, %v1592_v63  ;;  %v1428_v2 = vld [vmem:[#allocation2 + $0x1b0] sm:$0xff]  ;;  %v1266_v3 = vadd.f32 %v1143_v1, %v352_v61 }
 0x176   : > { %v1496_v4 = vadd.f32 %v2936_v21, %v1428_v2  ;;  %v1397_v6 = vld [vmem:[#allocation2 + $0xb8] sm:$0xff]  ;;  %1362 = vst.msk [vmem:[#allocation2 + $0x1b8] sm:$0xff] %vm263_vm0, %v1297_v0 }
 0x177   : > { %v1465_v7 = vadd.f32 %v2936_v21, %v1397_v6  ;;  %1331 = vst.msk [vmem:[#allocation2 + $0xc0] sm:$0xff] %vm263_vm0, %v1266_v3  ;;  %v1053_v36 = vpop.f32.mrf.mxu2  ;;  %v387_v0 = vld [vmem:[#allocation2 + $0x1d8] sm:$0xff] }
 0x178   : > { %v1560_v8 = vmax.f32 %v1496_v4, 0.0  ;;  %v1222_v10 = vpop.f32.mrf.mxu3 }
 0x179   : > { %v1529_v11 = vmax.f32 %v1465_v7, 0.0  ;;  %v1223_v12 = vadd.f32 %v1222_v10, %v1053_v36  ;;  %v975_v13 = vpop.f32.mrf.mxu0  ;;  %v356_v7 = vld [vmem:[#allocation2 + $0xe0] sm:$0xff] }
 0x17a   : > { %v1624_v14 = vpack.c.bf16 %v1560_v8, %v1560_v8  ;;  %v1144_v16 = vpop.f32.mrf.mxu1 }
 0x17b   : > { %v1593_v17 = vpack.c.bf16 %v1529_v11, %v1529_v11  ;;  %v1298_v18 = vadd.f32 %v1223_v12, %v384_v9  ;;  %v1145_v19 = vadd.f32 %v1144_v16, %v975_v13 }
 0x17c   : > { %1689 = vst.msk [vmem:[%s2723_s6 + $0xd8] sm:$0xf] %vm1634_vm1, %v1624_v14 }
 0x17d   : > { %1658 = vst.msk [vmem:[%s2723_s6 + $0x5c] sm:$0xf] %vm1634_vm1, %v1593_v17  ;;  %v1429_v5 = vld [vmem:[#allocation2 + $0x1b8] sm:$0xff]  ;;  %v1267_v20 = vadd.f32 %v1145_v19, %v353_v15 }
 0x17e   : > { %v1497_v22 = vadd.f32 %v2936_v21, %v1429_v5  ;;  %v1398_v23 = vld [vmem:[#allocation2 + $0xc0] sm:$0xff]  ;;  %1363 = vst.msk [vmem:[#allocation2 + $0x1c0] sm:$0xff] %vm263_vm0, %v1298_v18 }
 0x17f   : > { %v1466_v24 = vadd.f32 %v2936_v21, %v1398_v23  ;;  %1332 = vst.msk [vmem:[#allocation2 + $0xc8] sm:$0xff] %vm263_vm0, %v1267_v20  ;;  %v1055_v25 = vpop.f32.mrf.mxu2  ;;  %v388_v18 = vld [vmem:[#allocation2 + $0x1e0] sm:$0xff] }
 0x180   : > { %v1561_v26 = vmax.f32 %v1497_v22, 0.0  ;;  %v1224_v28 = vpop.f32.mrf.mxu3 }
 0x181   : > { %v1530_v29 = vmax.f32 %v1466_v24, 0.0  ;;  %v1225_v30 = vadd.f32 %v1224_v28, %v1055_v25  ;;  %v978_v31 = vpop.f32.mrf.mxu0  ;;  %v357_v24 = vld [vmem:[#allocation2 + $0xe8] sm:$0xff] }
 0x182   : > { %v1625_v32 = vpack.c.bf16 %v1561_v26, %v1561_v26  ;;  %v1147_v34 = vpop.f32.mrf.mxu1 }
 0x183   : > { %v1594_v35 = vpack.c.bf16 %v1530_v29, %v1530_v29  ;;  %v1299_v37 = vadd.f32 %v1225_v30, %v385_v27  ;;  %v1148_v38 = vadd.f32 %v1147_v34, %v978_v31 }
 0x184   : > { %1690 = vst.msk [vmem:[%s2723_s6 + $0xdc] sm:$0xf] %vm1634_vm1, %v1625_v32 }
 0x185   : > { %1659 = vst.msk [vmem:[%s2723_s6 + $0x60] sm:$0xf] %vm1634_vm1, %v1594_v35  ;;  %v1430_v39 = vld [vmem:[#allocation2 + $0x1c0] sm:$0xff]  ;;  %v1268_v40 = vadd.f32 %v1148_v38, %v354_v33 }
 0x186   : > { %v1498_v41 = vadd.f32 %v2936_v21, %v1430_v39  ;;  %v1399_v42 = vld [vmem:[#allocation2 + $0xc8] sm:$0xff]  ;;  %1364 = vst.msk [vmem:[#allocation2 + $0x1c8] sm:$0xff] %vm263_vm0, %v1299_v37 }
 0x187   : > { %v1467_v43 = vadd.f32 %v2936_v21, %v1399_v42  ;;  %1333 = vst.msk [vmem:[#allocation2 + $0xd0] sm:$0xff] %vm263_vm0, %v1268_v40  ;;  %v1058_v44 = vpop.f32.mrf.mxu2  ;;  %v389_v37 = vld [vmem:[#allocation2 + $0x1e8] sm:$0xff] }
 0x188   : > { %v1562_v45 = vmax.f32 %v1498_v41, 0.0  ;;  %v1227_v47 = vpop.f32.mrf.mxu3 }
 0x189   : > { %v1531_v48 = vmax.f32 %v1467_v43, 0.0  ;;  %v1228_v49 = vadd.f32 %v1227_v47, %v1058_v44  ;;  %v980_v50 = vpop.f32.mrf.mxu0  ;;  %v358_v43 = vld [vmem:[#allocation2 + $0xf0] sm:$0xff] }
 0x18a   : > { %v1626_v51 = vpack.c.bf16 %v1562_v45, %v1562_v45  ;;  %v1149_v53 = vpop.f32.mrf.mxu1 }
 0x18b   : > { %v1595_v54 = vpack.c.bf16 %v1531_v48, %v1531_v48  ;;  %v1300_v55 = vadd.f32 %v1228_v49, %v386_v46  ;;  %v1150_v56 = vadd.f32 %v1149_v53, %v980_v50 }
 0x18c   : > { %1691 = vst.msk [vmem:[%s2723_s6 + $0xe0] sm:$0xf] %vm1634_vm1, %v1626_v51 }
 0x18d   : > { %1660 = vst.msk [vmem:[%s2723_s6 + $0x64] sm:$0xf] %vm1634_vm1, %v1595_v54  ;;  %v1431_v57 = vld [vmem:[#allocation2 + $0x1c8] sm:$0xff]  ;;  %v1269_v58 = vadd.f32 %v1150_v56, %v355_v52 }
 0x18e   : > { %v1499_v59 = vadd.f32 %v2936_v21, %v1431_v57  ;;  %v1400_v60 = vld [vmem:[#allocation2 + $0xd0] sm:$0xff]  ;;  %1365 = vst.msk [vmem:[#allocation2 + $0x1d0] sm:$0xff] %vm263_vm0, %v1300_v55 }
 0x18f   : > { %v1468_v61 = vadd.f32 %v2936_v21, %v1400_v60  ;;  %1334 = vst.msk [vmem:[#allocation2 + $0xd8] sm:$0xff] %vm263_vm0, %v1269_v58  ;;  %v1060_v62 = vpop.f32.mrf.mxu2  ;;  %v390_v55 = vld [vmem:[#allocation2 + $0x1f0] sm:$0xff] }
 0x190   : > { %v1563_v63 = vmax.f32 %v1499_v59, 0.0  ;;  %v1229_v1 = vpop.f32.mrf.mxu3 }
 0x191   : > { %v1532_v2 = vmax.f32 %v1468_v61, 0.0  ;;  %v1230_v3 = vadd.f32 %v1229_v1, %v1060_v62  ;;  %v983_v4 = vpop.f32.mrf.mxu0  ;;  %v359_v61 = vld [vmem:[#allocation2 + $0xf8] sm:$0xff] }
 0x192   : > { %v1627_v6 = vpack.c.bf16 %v1563_v63, %v1563_v63  ;;  %v1152_v36 = vpop.f32.mrf.mxu1 }
 0x193   : > { %v1596_v8 = vpack.c.bf16 %v1532_v2, %v1532_v2  ;;  %v1301_v9 = vadd.f32 %v1230_v3, %v387_v0  ;;  %v1153_v10 = vadd.f32 %v1152_v36, %v983_v4 }
 0x194   : > { %1692 = vst.msk [vmem:[%s2723_s6 + $0xe4] sm:$0xf] %vm1634_vm1, %v1627_v6 }
 0x195   : > { %1661 = vst.msk [vmem:[%s2723_s6 + $0x68] sm:$0xf] %vm1634_vm1, %v1596_v8  ;;  %v1432_v11 = vld [vmem:[#allocation2 + $0x1d0] sm:$0xff]  ;;  %v1270_v12 = vadd.f32 %v1153_v10, %v356_v7 }
 0x196   : > { %v1500_v13 = vadd.f32 %v2936_v21, %v1432_v11  ;;  %v1401_v14 = vld [vmem:[#allocation2 + $0xd8] sm:$0xff]  ;;  %1366 = vst.msk [vmem:[#allocation2 + $0x1d8] sm:$0xff] %vm263_vm0, %v1301_v9 }
 0x197   : > { %v1469_v15 = vadd.f32 %v2936_v21, %v1401_v14  ;;  %1335 = vst.msk [vmem:[#allocation2 + $0xe0] sm:$0xff] %vm263_vm0, %v1270_v12  ;;  %v1063_v16 = vpop.f32.mrf.mxu2  ;;  %v391_v9 = vld [vmem:[#allocation2 + $0x1f8] sm:$0xff] }
 0x198   : > { %v1564_v17 = vmax.f32 %v1500_v13, 0.0  ;;  %v1232_v19 = vpop.f32.mrf.mxu3 }
 0x199   : > { %v1533_v5 = vmax.f32 %v1469_v15, 0.0  ;;  %v1233_v20 = vadd.f32 %v1232_v19, %v1063_v16  ;;  %v985_v22 = vpop.f32.mrf.mxu0 }
 0x19a   : > { %v1628_v23 = vpack.c.bf16 %v1564_v17, %v1564_v17  ;;  %v1154_v25 = vpop.f32.mrf.mxu1 }
 0x19b   : > { %v1597_v26 = vpack.c.bf16 %v1533_v5, %v1533_v5  ;;  %v1302_v27 = vadd.f32 %v1233_v20, %v388_v18  ;;  %v1155_v28 = vadd.f32 %v1154_v25, %v985_v22 }
 0x19c   : > { %1693 = vst.msk [vmem:[%s2723_s6 + $0xe8] sm:$0xf] %vm1634_vm1, %v1628_v23 }
 0x19d   : > { %1662 = vst.msk [vmem:[%s2723_s6 + $0x6c] sm:$0xf] %vm1634_vm1, %v1597_v26  ;;  %v1433_v29 = vld [vmem:[#allocation2 + $0x1d8] sm:$0xff]  ;;  %v1271_v30 = vadd.f32 %v1155_v28, %v357_v24 }
 0x19e   : > { %v1501_v31 = vadd.f32 %v2936_v21, %v1433_v29  ;;  %v1402_v32 = vld [vmem:[#allocation2 + $0xe0] sm:$0xff]  ;;  %1367 = vst.msk [vmem:[#allocation2 + $0x1e0] sm:$0xff] %vm263_vm0, %v1302_v27 }
 0x19f   : > { %v1470_v33 = vadd.f32 %v2936_v21, %v1402_v32  ;;  %1336 = vst.msk [vmem:[#allocation2 + $0xe8] sm:$0xff] %vm263_vm0, %v1271_v30  ;;  %v1065_v34 = vpop.f32.mrf.mxu2 }
 0x1a0   : > { %v1565_v35 = vmax.f32 %v1501_v31, 0.0  ;;  %v1234_v38 = vpop.f32.mrf.mxu3 }
 0x1a1   : > { %v1534_v39 = vmax.f32 %v1470_v33, 0.0  ;;  %v1235_v40 = vadd.f32 %v1234_v38, %v1065_v34  ;;  %v988_v41 = vpop.f32.mrf.mxu0 }
 0x1a2   : > { %v1629_v42 = vpack.c.bf16 %v1565_v35, %v1565_v35  ;;  %v1157_v44 = vpop.f32.mrf.mxu1 }
 0x1a3   : > { %v1598_v45 = vpack.c.bf16 %v1534_v39, %v1534_v39  ;;  %v1303_v46 = vadd.f32 %v1235_v40, %v389_v37  ;;  %v1158_v47 = vadd.f32 %v1157_v44, %v988_v41 }
 0x1a4   : > { %1694 = vst.msk [vmem:[%s2723_s6 + $0xec] sm:$0xf] %vm1634_vm1, %v1629_v42 }
 0x1a5   : > { %1663 = vst.msk [vmem:[%s2723_s6 + $0x70] sm:$0xf] %vm1634_vm1, %v1598_v45  ;;  %v1434_v48 = vld [vmem:[#allocation2 + $0x1e0] sm:$0xff]  ;;  %v1272_v49 = vadd.f32 %v1158_v47, %v358_v43 }
 0x1a6   : > { %v1502_v50 = vadd.f32 %v2936_v21, %v1434_v48  ;;  %v1403_v51 = vld [vmem:[#allocation2 + $0xe8] sm:$0xff]  ;;  %1368 = vst.msk [vmem:[#allocation2 + $0x1e8] sm:$0xff] %vm263_vm0, %v1303_v46 }
 0x1a7   : > { %v1471_v52 = vadd.f32 %v2936_v21, %v1403_v51  ;;  %1337 = vst.msk [vmem:[#allocation2 + $0xf0] sm:$0xff] %vm263_vm0, %v1272_v49  ;;  %v1068_v53 = vpop.f32.mrf.mxu2 }
 0x1a8   : > { %v1566_v54 = vmax.f32 %v1502_v50, 0.0  ;;  %v1237_v56 = vpop.f32.mrf.mxu3 }
 0x1a9   : > { %v1535_v57 = vmax.f32 %v1471_v52, 0.0  ;;  %v1238_v58 = vadd.f32 %v1237_v56, %v1068_v53  ;;  %v990_v59 = vpop.f32.mrf.mxu0 }
 0x1aa   : > { %v1630_v60 = vpack.c.bf16 %v1566_v54, %v1566_v54  ;;  %v1159_v62 = vpop.f32.mrf.mxu1 }
 0x1ab   : > { %v1599_v63 = vpack.c.bf16 %v1535_v57, %v1535_v57  ;;  %v1304_v0 = vadd.f32 %v1238_v58, %v390_v55  ;;  %v1160_v1 = vadd.f32 %v1159_v62, %v990_v59 }
 0x1ac   : > { %1695 = vst.msk [vmem:[%s2723_s6 + $0xf0] sm:$0xf] %vm1634_vm1, %v1630_v60 }
 0x1ad   : > { %1664 = vst.msk [vmem:[%s2723_s6 + $0x74] sm:$0xf] %vm1634_vm1, %v1599_v63  ;;  %v1435_v2 = vld [vmem:[#allocation2 + $0x1e8] sm:$0xff]  ;;  %v1273_v3 = vadd.f32 %v1160_v1, %v359_v61 }
 0x1ae   : > { %v1503_v4 = vadd.f32 %v2936_v21, %v1435_v2  ;;  %v1404_v6 = vld [vmem:[#allocation2 + $0xf0] sm:$0xff]  ;;  %1369 = vst.msk [vmem:[#allocation2 + $0x1f0] sm:$0xff] %vm263_vm0, %v1304_v0 }
 0x1af   : > { %v1472_v7 = vadd.f32 %v2936_v21, %v1404_v6  ;;  %1338 = vst.msk [vmem:[#allocation2 + $0xf8] sm:$0xff] %vm263_vm0, %v1273_v3  ;;  %v1070_v36 = vpop.f32.mrf.mxu2 }
 0x1b0   : > { %v1567_v8 = vmax.f32 %v1503_v4, 0.0  ;;  %v1239_v10 = vpop.f32.mrf.mxu3 }
 0x1b1   : > { %v1536_v11 = vmax.f32 %v1472_v7, 0.0  ;;  %v1240_v12 = vadd.f32 %v1239_v10, %v1070_v36 }
 0x1b2   : > { %v1631_v13 = vpack.c.bf16 %v1567_v8, %v1567_v8 }
 0x1b3   : > { %v1600_v14 = vpack.c.bf16 %v1536_v11, %v1536_v11  ;;  %v1305_v15 = vadd.f32 %v1240_v12, %v391_v9 }
 0x1b4   : > { %1696 = vst.msk [vmem:[%s2723_s6 + $0xf4] sm:$0xf] %vm1634_vm1, %v1631_v13 }
 0x1b5   : > { %1665 = vst.msk [vmem:[%s2723_s6 + $0x78] sm:$0xf] %vm1634_vm1, %v1600_v14  ;;  %v1436_v16 = vld [vmem:[#allocation2 + $0x1f0] sm:$0xff] }
 0x1b6   : > { %v1504_v17 = vadd.f32 %v2936_v21, %v1436_v16  ;;  %v1405_v18 = vld [vmem:[#allocation2 + $0xf8] sm:$0xff]  ;;  %1370 = vst.msk [vmem:[#allocation2 + $0x1f8] sm:$0xff] %vm263_vm0, %v1305_v15 }
 0x1b7   : > { %v1473_v19 = vadd.f32 %v2936_v21, %v1405_v18 }
 0x1b8   : > { %v1568_v5 = vmax.f32 %v1504_v17, 0.0 }
 0x1b9   : > { %v1537_v20 = vmax.f32 %v1473_v19, 0.0 }
 0x1ba   : > { %v1632_v22 = vpack.c.bf16 %v1568_v5, %v1568_v5 }
 0x1bb   : > { %v1601_v23 = vpack.c.bf16 %v1537_v20, %v1537_v20 }
 0x1bc   : > { %1697 = vst.msk [vmem:[%s2723_s6 + $0xf8] sm:$0xf] %vm1634_vm1, %v1632_v22 }
 0x1bd   : > { %1666 = vst.msk [vmem:[%s2723_s6 + $0x7c] sm:$0xf] %vm1634_vm1, %v1601_v23  ;;  %v1437_v24 = vld [vmem:[#allocation2 + $0x1f8] sm:$0xff] }
 0x1be   : > { %v1505_v25 = vadd.f32 %v2936_v21, %v1437_v24 }
 0x1c0   : > { %v1569_v26 = vmax.f32 %v1505_v25, 0.0 }
 0x1c2   : > { %v1633_v27 = vpack.c.bf16 %v1569_v26, %v1569_v26 }
 0x1c4   : > { %1698 = vst.msk [vmem:[%s2723_s6 + $0xfc] sm:$0xf] %vm1634_vm1, %v1633_v27 }
 0x1c5   : > { %2348 = shalt.err (!%p2345_p5)
}
 0x1c6   : > { %s2402_s4 = smov 64   ;;  %s2403_s6 = smov 4  }
 0x1c7   : > { %2261 = dma.vmem_to_hbm [thread:$0]  (%p2464_p4), %s1714_s11, 4096, %s1716_s21, %s1700_s15, %s2402_s4, %s2402_s4, %s2403_s6  }
 0x1c8 PF: > { %p2267_p6 = scmp.ge.s32.totalorder %s2399_s17, 2  ;;  %s1730_s7 = sand.u32 1, %s2379_s12  }
 0x1c9   : > { %s1731_s8 = scalar_lea.sflag [#allocation4], %s1730_s7 }
 0x1ca   : > { %p2264_p7 = pnand %p2267_p6, %p2471_p8 }
 0x1cc   : > { %p2265_p9 = pneg %p2264_p7 }
 0x1ce   : > { %2374 = dma.done.wait (%p2265_p9), %s1731_s8, 4096  }
 0x1cf   : > { %2376 = vsyncadd (%p2265_p9), %s1731_s8, 4294963200  ;;  %s16_s17 = sadd.s32 1, %s2399_s17   ;;  %s3105_s12 = smov %s2383_s13 }
 0x1d0   : > { %p13_p10 = scmp.ge.s32.totalorder %s16_s17, 6   ;;  %s3106_s13 = smov %s2387_s14 }
 0x1d1   : > { %s3107_s14 = smov %s2477_s25  ;;  %s3108_s15 = smov %s2395_s16 }
 0x1d2   : > { %s3109_s16 = smov %s3111_s20  ;;  %15 = sbr.rel (!%p13_p10) target bundleno = 4 (0x4), region = 81 }
 0x1d7   :  { %1737 = vsyncpa [#allocation4], 1 }
 0x1d8   :  { %1739 = vsyncpa [#allocation4 + $0x1], 1 }

</bundles_post_ra>
